<compile_context>
chip_gen: v5e
topology: v5e:2x2
jax: 0.10.0
libtpu: 0.0.40
codegen_flags: <defaults>
</compile_context>

<pallas_src>
import jax
import jax.numpy as jnp
from jax.experimental import pallas as pl
from jax.experimental.pallas import tpu as pltpu


def _tanprec_kernel(x_ref, o_ref, w_in_ref, w_o_ref, w_out_ref, out_ref):
    Hp = w_in_ref.shape[1]

    x_bf = x_ref[...].astype(jnp.bfloat16)          # (TB, inputDim)
    o_bf = o_ref[...].astype(jnp.bfloat16)          # (TB, oDim)

    # MXU matmul 1: hiddenLinear (its bias is folded into the o_i-side beta weights).
    h_lin = jnp.dot(x_bf, w_in_ref[...],
                    preferred_element_type=jnp.float32)                  # (TB, Hp)

    # MXU matmul 2 (fully fused o_i side):
    #   cols [0:Hp)      -> hiddenLambda
    #   cols [Hp:2Hp)    -> hiddenBeta   (+ folded hiddenLinear bias)
    #   col  [2Hp]       -> outputLambda
    #   col  [2Hp+1]     -> outputBeta   (+ folded outputLinear bias)
    hf = jnp.dot(o_bf, w_o_ref[...],
                 preferred_element_type=jnp.float32)                     # (TB, 2Hp+2)

    hidden = jnp.maximum(hf[:, :Hp] * h_lin + hf[:, Hp:2 * Hp], 0.0)     # (TB, Hp) f32

    # outputLinear as VPU multiply + lane reduction (no N=1 MXU matmul); fp32 throughout.
    lin = jnp.sum(hidden * w_out_ref[...], axis=-1, keepdims=True)       # (TB, 1)

    o_lam = hf[:, 2 * Hp:2 * Hp + 1]
    o_beta = hf[:, 2 * Hp + 1:2 * Hp + 2]
    out_ref[...] = o_lam * lin + o_beta


def prepare_params(w_hlin, b_hlin, w_hlam, w_hbeta, w_olin, b_olin,
                   w_olam, w_obeta):
    """Re-pack PyTorch-layout (out,in) weights ONCE into kernel layout.

    Transpose to (in,out), fold both biases into the o_i-side weights (exact, fp32),
    fuse [hiddenLambda | hiddenBeta_eff | outputLambda | outputBeta_eff] into a single
    (oDim, 2*Hp+2) operand, zero-pad H to a multiple of 128, cast MXU operands to bf16.
    """
    f32 = jnp.float32
    H, _ = w_hlin.shape
    Hp = ((H + 127) // 128) * 128

    w_in = jnp.transpose(w_hlin).astype(f32)               # (inputDim, H)
    w_hlam_t = jnp.transpose(w_hlam).astype(f32)           # (oDim, H)
    w_hbeta_t = jnp.transpose(w_hbeta).astype(f32)         # (oDim, H)
    w_olam_t = jnp.transpose(w_olam).astype(f32)           # (oDim, 1)
    w_obeta_t = jnp.transpose(w_obeta).astype(f32)         # (oDim, 1)
    w_out_row = jnp.reshape(w_olin.astype(f32), (1, H))    # (1, H)
    b_in_row = jnp.reshape(b_hlin.astype(f32), (1, H))     # (1, H)
    b_out = jnp.reshape(jnp.asarray(b_olin, f32), ())      # scalar

    # Exact bias folds (fp32, before the bf16 cast):
    #   lam*(x@W_in^T + b_in) + beta  == lam*(x@W_in^T) + o_i @ (W_hlam^T*b_in + W_hbeta^T)
    #   o_lam*(lin + b_out) + o_beta  == o_lam*lin      + o_i @ (b_out*W_olam^T + W_obeta^T)
    w_hbeta_eff = w_hbeta_t + w_hlam_t * b_in_row
    w_obeta_eff = w_obeta_t + b_out * w_olam_t

    def pad_h(a):   # zero-pad last dim H -> Hp (keeps in-kernel slices lane-aligned)
        return a if Hp == H else jnp.pad(a, ((0, 0), (0, Hp - H)))

    w_o = jnp.concatenate(
        [pad_h(w_hlam_t), pad_h(w_hbeta_eff), w_olam_t, w_obeta_eff],
        axis=1)                                            # (oDim, 2Hp+2)

    return dict(
        w_in=pad_h(w_in).astype(jnp.bfloat16),             # (inputDim, Hp)  bf16
        w_o=w_o.astype(jnp.bfloat16),                      # (oDim, 2Hp+2)   bf16, fused
        w_out=pad_h(w_out_row),                            # (1, Hp)         fp32 row
    )


def tanprec_forward(x, o_i, params, *, tile_b=512, vmem_limit_bytes=None):
    B, input_dim = x.shape
    o_dim = o_i.shape[1]
    Hp = params["w_in"].shape[1]

    # Batch tile: multiple of 8 sublanes; capped so tiny batches are not over-padded.
    tb = min(int(tile_b), ((B + 7) // 8) * 8)
    tb = max(8, (tb // 8) * 8)
    n_tiles = pl.cdiv(B, tb)
    Bp = n_tiles * tb
    if Bp != B:  # pad the ragged tail instead of falling back to one full-extent block
        x = jnp.pad(x, ((0, Bp - B), (0, 0)))
        o_i = jnp.pad(o_i, ((0, Bp - B), (0, 0)))

    act_bytes = x.dtype.itemsize
    if vmem_limit_bytes is None:
        # Rough per-step working set: double-buffered activation/output blocks +
        # fp32 intermediates (h_lin, hf, hidden, product). Only raise the limit for
        # very large tile_b sweeps; otherwise keep the compiler default.
        est = (2 * tb * (input_dim + o_dim) * act_bytes + 2 * tb * 4
               + tb * (4 * Hp + 3) * 4)
        if est > 12 * 1024 * 1024:
            vmem_limit_bytes = min(2 * est, 100 * 1024 * 1024)

    flops = 2 * Bp * (input_dim * Hp + o_dim * (2 * Hp + 2) + Hp)
    bytes_accessed = (Bp * (input_dim + o_dim) * act_bytes + Bp * 4
                      + params["w_in"].size * 2 + params["w_o"].size * 2
                      + params["w_out"].size * 4)

    def batch_spec(d):
        return pl.BlockSpec((tb, d), lambda i: (i, 0))

    def resident_spec(shape):
        return pl.BlockSpec(shape, lambda i: (0, 0))

    out = pl.pallas_call(
        _tanprec_kernel,
        out_shape=jax.ShapeDtypeStruct((Bp, 1), jnp.float32),
        grid=(n_tiles,),
        in_specs=[
            batch_spec(input_dim),                 # x tile   (f32 or bf16 accepted)
            batch_spec(o_dim),                     # o_i tile (f32 or bf16 accepted)
            resident_spec((input_dim, Hp)),        # w_in  (bf16, resident)
            resident_spec((o_dim, 2 * Hp + 2)),    # w_o   (bf16, resident, fused+folded)
            resident_spec((1, Hp)),                # w_out (fp32 row, resident)
        ],
        out_specs=batch_spec(1),
        compiler_params=pltpu.CompilerParams(
            # "parallel" lets Mosaic shard the batch grid across v7x's two TensorCores.
            dimension_semantics=("parallel",),
            vmem_limit_bytes=vmem_limit_bytes),
        cost_estimate=pl.CostEstimate(flops=flops, transcendentals=0,
                                      bytes_accessed=bytes_accessed),
    )(x, o_i, params["w_in"], params["w_o"], params["w_out"])

    return out[:B] if Bp != B else out


if __name__ == "__main__":
    B, input_dim, o_dim, H = 1024, 64, 32, 128

    key = jax.random.PRNGKey(0)
    ks = jax.random.split(key, 10)
    x = jax.random.normal(ks[0], (B, input_dim), jnp.float32)
    o_i = jax.random.normal(ks[1], (B, o_dim), jnp.float32)
    # PyTorch nn.Linear layout: (out_features, in_features)
    w_hlin = jax.random.normal(ks[2], (H, input_dim), jnp.float32) * 0.05
    b_hlin = jax.random.normal(ks[3], (H,), jnp.float32) * 0.05
    w_hlam = jax.random.normal(ks[4], (H, o_dim), jnp.float32) * 0.05
    w_hbeta = jax.random.normal(ks[5], (H, o_dim), jnp.float32) * 0.05
    w_olin = jax.random.normal(ks[6], (1, H), jnp.float32) * 0.05
    b_olin = jax.random.normal(ks[7], (1,), jnp.float32) * 0.05
    w_olam = jax.random.normal(ks[8], (1, o_dim), jnp.float32) * 0.05
    w_obeta = jax.random.normal(ks[9], (1, o_dim), jnp.float32) * 0.05

    params = prepare_params(w_hlin, b_hlin, w_hlam, w_hbeta,
                            w_olin, b_olin, w_olam, w_obeta)

    out = tanprec_forward(x, o_i, params)                          # divisible-B path
    out_ragged = tanprec_forward(x[:1000], o_i[:1000], params)     # padded-tail path
    jax.block_until_ready((out, out_ragged))

    # (a) exact fp32 PyTorch-forward semantics
    h_lin32 = x @ w_hlin.T + b_hlin
    hid32 = jnp.maximum((o_i @ w_hlam.T) * h_lin32 + (o_i @ w_hbeta.T), 0.0)
    ref32 = (o_i @ w_olam.T) * (hid32 @ w_olin.T + b_olin) + (o_i @ w_obeta.T)

    # (b) reference matching the kernel arithmetic exactly (folded/fused bf16 params,
    #     fp32 MXU accumulate, fp32 VPU reduction for outputLinear)
    Hp = params["w_in"].shape[1]

    def kernel_ref(xa, oa):
        xb = xa.astype(jnp.bfloat16)
        ob = oa.astype(jnp.bfloat16)
        h_lin = jnp.dot(xb, params["w_in"], preferred_element_type=jnp.float32)
        hf = jnp.dot(ob, params["w_o"], preferred_element_type=jnp.float32)
        hid = jnp.maximum(hf[:, :Hp] * h_lin + hf[:, Hp:2 * Hp], 0.0)
        lin = jnp.sum(hid * params["w_out"], axis=-1, keepdims=True)
        return hf[:, 2 * Hp:2 * Hp + 1] * lin + hf[:, 2 * Hp + 1:2 * Hp + 2]

    ref16 = kernel_ref(x, o_i)

    assert out.shape == (B, 1)
    assert out_ragged.shape == (1000, 1)
    assert jnp.allclose(out, ref16, atol=1e-3, rtol=1e-3), \
        float(jnp.max(jnp.abs(out - ref16)))
    assert jnp.allclose(out_ragged, ref16[:1000], atol=1e-3, rtol=1e-3), \
        float(jnp.max(jnp.abs(out_ragged - ref16[:1000])))
    assert jnp.allclose(out, ref32, atol=5e-2, rtol=5e-2), \
        float(jnp.max(jnp.abs(out - ref32)))

    print("KERNEL_OK")
</pallas_src>

<mosaic_0001>
module attributes {stable_mosaic.version = 11 : i64} {
  func.func @_tanprec_kernel(%arg0: i32, %arg1: memref<512x64xf32, #tpu.memory_space<vmem>>, %arg2: memref<512x32xf32, #tpu.memory_space<vmem>>, %arg3: memref<64x128xbf16, #tpu.memory_space<vmem>>, %arg4: memref<32x258xbf16, #tpu.memory_space<vmem>>, %arg5: memref<1x128xf32, #tpu.memory_space<vmem>>, %arg6: memref<512x1xf32, #tpu.memory_space<vmem>>) attributes {dimension_semantics = [#tpu.dimension_semantics<parallel>], iteration_bounds = array<i64: 2>, scalar_prefetch = 0 : i64, scratch_operands = 0 : i64, tpu.core_type = #tpu.core_type<tc>, window_params = [{transform_indices = @transform_0, window_bounds = array<i64: 512, 64>}, {transform_indices = @transform_1, window_bounds = array<i64: 512, 32>}, {pipeline_mode = #tpu.pipeline_mode<synchronous>, transform_indices = @transform_2, window_bounds = array<i64: 64, 128>}, {pipeline_mode = #tpu.pipeline_mode<synchronous>, transform_indices = @transform_3, window_bounds = array<i64: 32, 258>}, {pipeline_mode = #tpu.pipeline_mode<synchronous>, transform_indices = @transform_4, window_bounds = array<i64: 1, 128>}, {transform_indices = @transform_5, window_bounds = array<i64: 512, 1>}]} {
    %c0 = arith.constant 0 : index
    %c0_0 = arith.constant 0 : index
    %0 = vector.load %arg1[%c0, %c0_0] : memref<512x64xf32, #tpu.memory_space<vmem>>, vector<512x64xf32>
    %1 = arith.truncf %0 : vector<512x64xf32> to vector<512x64xbf16>
    %c0_1 = arith.constant 0 : index
    %c0_2 = arith.constant 0 : index
    %2 = vector.load %arg2[%c0_1, %c0_2] : memref<512x32xf32, #tpu.memory_space<vmem>>, vector<512x32xf32>
    %3 = arith.truncf %2 : vector<512x32xf32> to vector<512x32xbf16>
    %c0_3 = arith.constant 0 : index
    %c0_4 = arith.constant 0 : index
    %4 = vector.load %arg3[%c0_3, %c0_4] : memref<64x128xbf16, #tpu.memory_space<vmem>>, vector<64x128xbf16>
    %cst = arith.constant dense<0.000000e+00> : vector<512x128xf32>
    %5 = tpu.matmul %1, %4, %cst {dimension_numbers = #tpu.dot_dimension_numbers<[1], [0], [0], [1], [0, 0, 1, 1], [], []>} : vector<512x64xbf16>, vector<64x128xbf16>, vector<512x128xf32> -> vector<512x128xf32>
    %c0_5 = arith.constant 0 : index
    %c0_6 = arith.constant 0 : index
    %6 = vector.load %arg4[%c0_5, %c0_6] : memref<32x258xbf16, #tpu.memory_space<vmem>>, vector<32x258xbf16>
    %cst_7 = arith.constant dense<0.000000e+00> : vector<512x258xf32>
    %7 = tpu.matmul %3, %6, %cst_7 {dimension_numbers = #tpu.dot_dimension_numbers<[1], [0], [0], [1], [0, 0, 1, 1], [], []>} : vector<512x32xbf16>, vector<32x258xbf16>, vector<512x258xf32> -> vector<512x258xf32>
    %8 = vector.extract_strided_slice %7 {offsets = [0, 0], sizes = [512, 128], strides = [1, 1]} : vector<512x258xf32> to vector<512x128xf32>
    %9 = arith.mulf %8, %5 : vector<512x128xf32>
    %10 = vector.extract_strided_slice %7 {offsets = [0, 128], sizes = [512, 128], strides = [1, 1]} : vector<512x258xf32> to vector<512x128xf32>
    %11 = arith.addf %9, %10 : vector<512x128xf32>
    %cst_8 = arith.constant 0.000000e+00 : f32
    %12 = vector.broadcast %cst_8 : f32 to vector<512x128xf32>
    %13 = arith.maximumf %11, %12 : vector<512x128xf32>
    %c0_9 = arith.constant 0 : index
    %c0_10 = arith.constant 0 : index
    %14 = vector.load %arg5[%c0_9, %c0_10] : memref<1x128xf32, #tpu.memory_space<vmem>>, vector<1x128xf32>
    %15 = vector.broadcast %14 : vector<1x128xf32> to vector<512x128xf32>
    %16 = arith.mulf %13, %15 : vector<512x128xf32>
    %cst_11 = arith.constant dense<0.000000e+00> : vector<512xf32>
    %17 = vector.multi_reduction <add>, %16, %cst_11 [1] : vector<512x128xf32> to vector<512xf32>
    %18 = vector.shape_cast %17 : vector<512xf32> to vector<512x1xf32>
    %19 = vector.extract_strided_slice %7 {offsets = [0, 256], sizes = [512, 1], strides = [1, 1]} : vector<512x258xf32> to vector<512x1xf32>
    %20 = vector.extract_strided_slice %7 {offsets = [0, 257], sizes = [512, 1], strides = [1, 1]} : vector<512x258xf32> to vector<512x1xf32>
    %21 = arith.mulf %19, %18 : vector<512x1xf32>
    %22 = arith.addf %21, %20 : vector<512x1xf32>
    %c0_12 = arith.constant 0 : index
    %c0_13 = arith.constant 0 : index
    %23 = vector.load %arg6[%c0_12, %c0_13] : memref<512x1xf32, #tpu.memory_space<vmem>>, vector<512x1xf32>
    tpu.vector_store %arg6[%c0_12, %c0_13], %22 {strides = array<i32>} : memref<512x1xf32, #tpu.memory_space<vmem>>, vector<512x1xf32>,
    return
  }
  func.func @transform_0(%arg0: i32) -> (i32, i32) {
    %c0_i32 = arith.constant 0 : i32
    %c0_i32_0 = arith.constant 0 : i32
    return %arg0, %c0_i32 : i32, i32
  }
  func.func @transform_1(%arg0: i32) -> (i32, i32) {
    %c0_i32 = arith.constant 0 : i32
    %c0_i32_0 = arith.constant 0 : i32
    return %arg0, %c0_i32 : i32, i32
  }
  func.func @transform_2(%arg0: i32) -> (i32, i32) {
    %c0_i32 = arith.constant 0 : i32
    %c0_i32_0 = arith.constant 0 : i32
    %c0_i32_1 = arith.constant 0 : i32
    return %c0_i32, %c0_i32_0 : i32, i32
  }
  func.func @transform_3(%arg0: i32) -> (i32, i32) {
    %c0_i32 = arith.constant 0 : i32
    %c0_i32_0 = arith.constant 0 : i32
    %c0_i32_1 = arith.constant 0 : i32
    return %c0_i32, %c0_i32_0 : i32, i32
  }
  func.func @transform_4(%arg0: i32) -> (i32, i32) {
    %c0_i32 = arith.constant 0 : i32
    %c0_i32_0 = arith.constant 0 : i32
    %c0_i32_1 = arith.constant 0 : i32
    return %c0_i32, %c0_i32_0 : i32, i32
  }
  func.func @transform_5(%arg0: i32) -> (i32, i32) {
    %c0_i32 = arith.constant 0 : i32
    %c0_i32_0 = arith.constant 0 : i32
    return %arg0, %c0_i32 : i32, i32
  }
}

</mosaic_0001>

<bundles_post_ra>
// kernel: tpu_custom_call.1
= control target key start
LH: loop header
LB: loop body
LE: loop exit
PB: predicated region body
PF: predicated region fallthrough
CT: control target
= control target key end

     0   :  { %s2532_s18 = smov 0   ;;  %s3415_s0 = inlined_call_operand.vmem [shape: f32[1024,64], index: 0, kind: input, shape index: {}]   ;;  %s3416_s1 = inlined_call_operand.vmem [shape: f32[1024,32], index: 1, kind: input, shape index: {}]   ;;  %s3417_s2 = inlined_call_operand.vmem [shape: bf16[64,128], index: 2, kind: input, shape index: {}]   ;;  %s3418_s3 = inlined_call_operand.vmem [shape: bf16[32,258], index: 3, kind: input, shape index: {}]   ;;  %s3419_s4 = inlined_call_operand.vmem [shape: f32[1,128], index: 4, kind: input, shape index: {}]   ;;  %s3420_s5 = inlined_call_operand.vmem [shape: f32[1024,1], index: 5, kind: output, shape index: {}]  }
   0x1 LB: > { %s2290_s19 = sadd.s32 4294967295, %s2499_s18   ;;  %p2294_p0 = scmp.ge.s32.totalorder %s2499_s18, 1  ;;  %s2499_s18 = sphi %s2532_s18, %s15_s18  }
   0x2   : > { %p199_p1 = scmp.lt.s32.totalorder %s2499_s18, 3 }
   0x4   : > { %p200_p2 = pnand %p2294_p0, %p199_p1 }
   0x5   : > { %s2295_s26 = sshll.u32 (!%p200_p2), %s2290_s19, 6  ;;  %s2501_s11 = smov (!%p200_p2), 127  }
   0x6   : > { %203 = sbr.rel (%p200_p2) target bundleno = 1619 (0x653), region = 40  ;;  %p233_p3 = scmp.lt.s32.totalorder (!%p200_p2), %s2295_s26, 127 }
   0xb   : > { %v2474_v0 = vld [vmem:[%s3417_s2 + $0x18] sm:$0xff]  ;;  %v2371_v1 = vld [vmem:[%s3418_s3 + $0x20] sm:$0xf]  ;;  %v2480_v2 = vld [vmem:[%s3418_s3 + $0x28] sm:$0xf0]  ;;  %s3422_s26 = smov (!%p233_p3, %s2295_s26), 127 }
   0xc   : > { %v2372_v3 = vor.u32 %v2480_v2, %v2371_v1  ;;  %v2478_v4 = vld [vmem:[%s3418_s3 + $0x1c] sm:$0xf]  ;;  %v2365_v5 = vld [vmem:[%s3418_s3 + $0x24] sm:$0xf0]  ;;  %576 = vmatpush.bf16.msra.mxu0 %v2474_v0  ;;  %v2473_v6 = vld [vmem:[%s3417_s2 + $0x10] sm:$0xff]  ;;  %s2579_s23 = sshll.u32 %s3422_s26, 3 }
   0xd   : > { %v2368_v7 = vor.u32 %v2478_v4, %v2365_v5  ;;  %v2359_v8 = vld [vmem:[%s3418_s3 + $0x8] sm:$0xf]  ;;  %v2477_v9 = vld [vmem:[%s3418_s3 + $0x10] sm:$0xf0]  ;;  %v2363_v11 = vld [vmem:[%s3418_s3 + $0x18] sm:$0xf]  ;;  %s2588_s29 = scalar_lea.vmem %s3416_s1, %s2579_s23  ;;  %s2599_s8 = scalar_lea.vmem %s3415_s0, %s2579_s23 }
   0xe   : > { %1222 = vmatpush.bf16.msra.mxu3 %v2372_v3  ;;  %v2360_v10 = vor.u32 %v2477_v9, %v2359_v8  ;;  %v2479_v12 = vld [vmem:[%s3418_s3 + $0x20] sm:$0xf0]  ;;  %v2353_v15 = vld [vmem:[%s3418_s3 + $0xc] sm:$0xf0]  ;;  %v2351_v16 = vld [vmem:[%s3418_s3] sm:$0xf]  ;;  %s2706_s16 = scalar_lea.vmem %s3420_s5, %s2579_s23 }
   0xf   : > { %1053 = vmatpush.bf16.msra.mxu2 %v2368_v7  ;;  %v2364_v13 = vor.u32 %v2479_v12, %v2363_v11  ;;  %v2475_v14 = vld [vmem:[%s3418_s3 + $0x4] sm:$0xf]  ;;  %v2476_v18 = vld [vmem:[%s3418_s3 + $0x8] sm:$0xf0]  ;;  %vm781_vm0 = vcmask 261120   ;;  %vm475_vm1 = vcmask 523264  }
  0x10   : > { %v2356_v17 = vor.u32 %v2475_v14, %v2353_v15  ;;  %577 = vmatpush.bf16.msra.mxu0 %v2473_v6  ;;  %v2472_v19 = vld [vmem:[%s3417_s2 + $0x8] sm:$0xff]  ;;  %v347_v20 = vld [vmem:[%s2588_s29] sm:$0xff]  ;;  %v2352_v22 = vor.u32 %v2476_v18, %v2351_v16  ;;  %v349_v28 = vld [vmem:[%s2588_s29 + $0x10] sm:$0xff]  ;;  %vm2157_vm2 = vcmask 7168  }
  0x11   : > { %884 = vmatpush.bf16.msra.mxu1 %v2364_v13  ;;  %v348_v21 = vld [vmem:[%s2588_s29 + $0x8] sm:$0xff]  ;;  %v2471_v24 = vld [vmem:[%s3417_s2] sm:$0xff]  ;;  %v350_v29 = vld [vmem:[%s2588_s29 + $0x18] sm:$0xff] }
  0x12   : > { %1223 = vmatpush.bf16.msra.mxu3 %v2360_v10  ;;  %v411_v23 = vpack.c.bf16 %v348_v21, %v347_v20  ;;  %v251_v25 = vld [vmem:[%s2599_s8] sm:$0xff]  ;;  %v252_v26 = vld [vmem:[%s2599_s8 + $0x8] sm:$0xff]  ;;  %v412_v30 = vpack.c.bf16 %v350_v29, %v349_v28  ;;  %v253_v31 = vld [vmem:[%s2599_s8 + $0x10] sm:$0xff] }
  0x13   : > { %1054 = vmatpush.bf16.msra.mxu2 %v2356_v17  ;;  %v315_v27 = vpack.c.bf16 %v252_v26, %v251_v25  ;;  %v254_v32 = vld [vmem:[%s2599_s8 + $0x18] sm:$0xff]  ;;  %v351_v34 = vld [vmem:[%s2588_s29 + $0x20] sm:$0xff]  ;;  %v352_v35 = vld [vmem:[%s2588_s29 + $0x28] sm:$0xff] }
  0x14   : > { %578 = vmatpush.bf16.msra.mxu0 %v2472_v19  ;;  %v316_v33 = vpack.c.bf16 %v254_v32, %v253_v31  ;;  %v413_v36 = vpack.c.bf16 %v352_v35, %v351_v34  ;;  %v255_v37 = vld [vmem:[%s2599_s8 + $0x20] sm:$0xff]  ;;  %v256_v38 = vld [vmem:[%s2599_s8 + $0x28] sm:$0xff]  ;;  %v353_v40 = vld [vmem:[%s2588_s29 + $0x30] sm:$0xff] }
  0x15   : > { %2437 = vmatmul.msk.bf16.vlgmr.msra.gmra.mxu3 %vm781_vm0, %v411_v23  ;;  %885 = vmatpush.bf16.msra.mxu1 %v2352_v22  ;;  %v317_v39 = vpack.c.bf16 %v256_v38, %v255_v37  ;;  %v354_v41 = vld [vmem:[%s2588_s29 + $0x38] sm:$0xff]  ;;  %v257_v43 = vld [vmem:[%s2599_s8 + $0x30] sm:$0xff]  ;;  %v355_v46 = vld [vmem:[%s2588_s29 + $0x40] sm:$0xff] }
  0x16   : > { %2405 = vmatmul.msk.bf16.vlgmr.msra.gmra.mxu2 %vm781_vm0, %v411_v23  ;;  %v414_v42 = vpack.c.bf16 %v354_v41, %v353_v40  ;;  %v258_v44 = vld [vmem:[%s2599_s8 + $0x38] sm:$0xff]  ;;  %v356_v47 = vld [vmem:[%s2588_s29 + $0x48] sm:$0xff]  ;;  %v2646_v55 = vld [vmem:[%s3419_s4] ss:$0 sm:$0xff] }
  0x17   : > { %v318_v45 = vpack.c.bf16 %v258_v44, %v257_v43  ;;  %v415_v48 = vpack.c.bf16 %v356_v47, %v355_v46  ;;  %v259_v59 = vld [vmem:[%s2599_s8 + $0x40] sm:$0xff]  ;;  %v260_v60 = vld [vmem:[%s2599_s8 + $0x48] sm:$0xff]  ;;  %v357_v61 = vld [vmem:[%s2588_s29 + $0x50] sm:$0xff] }
  0x18   : > { %579 = vmatpush.bf16.msra.mxu0 %v2471_v24  ;;  %2373 = vmatmul.msk.bf16.vlgmr.msra.gmra.mxu1 %vm781_vm0, %v411_v23  ;;  %v319_v62 = vpack.c.bf16 %v260_v60, %v259_v59  ;;  %v358_v63 = vld [vmem:[%s2588_s29 + $0x58] sm:$0xff]  ;;  %v359_v15 = vld [vmem:[%s2588_s29 + $0x60] sm:$0xff]  ;;  %v360_v16 = vld [vmem:[%s2588_s29 + $0x68] sm:$0xff] }
  0x19   : > { %v416_v0 = vpack.c.bf16 %v358_v63, %v357_v61  ;;  %v417_v17 = vpack.c.bf16 %v360_v16, %v359_v15  ;;  %v262_v31 = vld [vmem:[%s2599_s8 + $0x58] sm:$0xff]  ;;  %v263_v35 = vld [vmem:[%s2599_s8 + $0x60] sm:$0xff]  ;;  %v361_v41 = vld [vmem:[%s2588_s29 + $0x70] sm:$0xff] }
  0x1a   : > { %v363_v15 = vld [vmem:[%s2588_s29 + $0x80] sm:$0xff]  ;;  %v364_v16 = vld [vmem:[%s2588_s29 + $0x88] sm:$0xff] }
  0x1b   : > { %2317 = vmatmul.msk.bf16.vlgmr.msra.gmra.mxu0 %vm475_vm1, %v315_v27 }
  0x25   : > { %2438 = vmatmul.msk.bf16.gmra.mxu3 %vm781_vm0, %v412_v30 }
  0x26   : > { %2406 = vmatmul.msk.bf16.gmra.mxu2 %vm781_vm0, %v412_v30 }
  0x28   : > { %2374 = vmatmul.msk.bf16.gmra.mxu1 %vm781_vm0, %v412_v30  ;;  %v261_v30 = vld [vmem:[%s2599_s8 + $0x50] sm:$0xff] }
  0x29   : > { %v320_v32 = vpack.c.bf16 %v262_v31, %v261_v30 }
  0x2b   : > { %2318 = vmatmul.msk.bf16.gmra.mxu0 %vm475_vm1, %v316_v33 }
  0x35   : > { %2439 = vmatmul.msk.bf16.gmra.mxu3 %vm781_vm0, %v413_v36 }
  0x36   : > { %2407 = vmatmul.msk.bf16.gmra.mxu2 %vm781_vm0, %v413_v36 }
  0x38   : > { %2375 = vmatmul.msk.bf16.gmra.mxu1 %vm781_vm0, %v413_v36  ;;  %v264_v36 = vld [vmem:[%s2599_s8 + $0x68] sm:$0xff] }
  0x39   : > { %v321_v37 = vpack.c.bf16 %v264_v36, %v263_v35 }
  0x3b   : > { %2319 = vmatmul.msk.bf16.gmra.mxu0 %vm475_vm1, %v317_v39 }
  0x45   : > { %2440 = vmatmul.msk.bf16.gmra.mxu3 %vm781_vm0, %v414_v42 }
  0x46   : > { %2408 = vmatmul.msk.bf16.gmra.mxu2 %vm781_vm0, %v414_v42 }
  0x48   : > { %2376 = vmatmul.msk.bf16.gmra.mxu1 %vm781_vm0, %v414_v42  ;;  %v362_v42 = vld [vmem:[%s2588_s29 + $0x78] sm:$0xff] }
  0x49   : > { %v418_v44 = vpack.c.bf16 %v362_v42, %v361_v41 }
  0x4b   : > { %2320 = vmatmul.msk.bf16.gmra.mxu0 %vm475_vm1, %v318_v45 }
  0x55   : > { %2441 = vmatmul.msk.bf16.gmra.mxu3 %vm781_vm0, %v415_v48 }
  0x56   : > { %2409 = vmatmul.msk.bf16.gmra.mxu2 %vm781_vm0, %v415_v48 }
  0x58   : > { %2377 = vmatmul.msk.bf16.gmra.mxu1 %vm781_vm0, %v415_v48 }
  0x5b   : > { %2321 = vmatmul.msk.bf16.gmra.mxu0 %vm475_vm1, %v319_v62 }
  0x65   : > { %2442 = vmatmul.msk.bf16.gmra.mxu3 %vm781_vm0, %v416_v0 }
  0x66   : > { %2410 = vmatmul.msk.bf16.gmra.mxu2 %vm781_vm0, %v416_v0 }
  0x68   : > { %2378 = vmatmul.msk.bf16.gmra.mxu1 %vm781_vm0, %v416_v0 }
  0x6b   : > { %2322 = vmatmul.msk.bf16.gmra.mxu0 %vm475_vm1, %v320_v32 }
  0x75   : > { %2443 = vmatmul.msk.bf16.gmra.mxu3 %vm781_vm0, %v417_v17 }
  0x76   : > { %2411 = vmatmul.msk.bf16.gmra.mxu2 %vm781_vm0, %v417_v17 }
  0x78   : > { %2379 = vmatmul.msk.bf16.gmra.mxu1 %vm781_vm0, %v417_v17 }
  0x7b   : > { %2323 = vmatmul.msk.bf16.gmra.mxu0 %vm475_vm1, %v321_v37 }
  0x85   : > { %2444 = vmatmul.msk.bf16.gmra.mxu3 %vm781_vm0, %v418_v44 }
  0x86   : > { %2412 = vmatmul.msk.bf16.gmra.mxu2 %vm781_vm0, %v418_v44 }
  0x88   : > { %2380 = vmatmul.msk.bf16.gmra.mxu1 %vm781_vm0, %v418_v44 }
  0x95   : > { %v887_v49 = vpop.f32.mrf.mxu1 }
  0x98   : > { %v2639_v50 = vpop.f32.mrf.mxu3  ;;  %v581_v51 = vpop.f32.mrf.mxu0 }
  0x99   : > { %1901 = vrot.lane.b32.xlu1 %v2639_v50, %s2501_s11  ;;  %v1056_v52 = vpop.f32.mrf.mxu2  ;;  %v1385_v53 = vmul.f32 %v887_v49, %v581_v51 }
  0x9b   : > { %v1449_v54 = vadd.f32 %v1385_v53, %v1056_v52 }
  0x9d   : > { %v1513_v56 = vmax.f32 %v1449_v54, 0.0  ;;  %v889_v1 = vpop.f32.mrf.mxu1 }
  0x9f   : > { %v1581_v58 = vmul.f32 %v2646_v55, %v1513_v56 }
  0xa0   : > { %v2648_v57 = vpop.f32.mrf.mxu3  ;;  %v583_v3 = vpop.f32.mrf.mxu0 }
  0xa1   : > { %1903 = vrot.lane.b32.xlu2 %v2648_v57, %s2501_s11  ;;  %1645 = vadd.xlane.f32.xlu0 %v1581_v58  ;;  %v1058_v4 = vpop.f32.mrf.mxu2  ;;  %v1386_v24 = vmul.f32 %v889_v1, %v583_v3 }
  0xa3   : > { %v1450_v26 = vadd.f32 %v1386_v24, %v1058_v4 }
  0xa5   : > { %v892_v7 = vpop.f32.mrf.mxu1  ;;  %v1514_v28 = vmax.f32 %v1450_v26, 0.0 }
  0xa7   : > { %v1582_v33 = vmul.f32 %v2646_v55, %v1514_v28 }
  0xa8   : > { %v2660_v2 = vpop.f32.mrf.mxu3  ;;  %v586_v6 = vpop.f32.mrf.mxu0 }
  0xa9   : > { %v1387_v8 = vmul.f32 %v892_v7, %v586_v6  ;;  %v1061_v9 = vpop.f32.mrf.mxu2  ;;  %v265_v6 = vld [vmem:[%s2599_s8 + $0x70] sm:$0xff]  ;;  %v266_v7 = vld [vmem:[%s2599_s8 + $0x78] sm:$0xff] }
  0xab   : > { %v1451_v10 = vadd.f32 %v1387_v8, %v1061_v9  ;;  %v322_v8 = vpack.c.bf16 %v266_v7, %v265_v6 }
  0xad   : > { %v1515_v11 = vmax.f32 %v1451_v10, 0.0  ;;  %v894_v13 = vpop.f32.mrf.mxu1  ;;  %2324 = vmatmul.msk.bf16.gmra.mxu0 %vm475_vm1, %v322_v8 }
  0xaf   : > { %v1583_v14 = vmul.f32 %v2646_v55, %v1515_v11 }
  0xb0   : > { %v2663_v5 = vpop.f32.mrf.mxu3  ;;  %v588_v12 = vpop.f32.mrf.mxu0 }
  0xb1   : > { %1907 = vrot.lane.b32.xlu2 %v2663_v5, %s2501_s11  ;;  %v1063_v18 = vpop.f32.mrf.mxu2  ;;  %v1388_v39 = vmul.f32 %v894_v13, %v588_v12 }
  0xb3   : > { %v1452_v40 = vadd.f32 %v1388_v39, %v1063_v18  ;;  %v419_v18 = vpack.c.bf16 %v364_v16, %v363_v15  ;;  %v365_v39 = vld [vmem:[%s2588_s29 + $0x90] sm:$0xff] }
  0xb5   : > { %1905 = vrot.lane.b32.xlu0 %v2660_v2, %s2501_s11  ;;  %v897_v20 = vpop.f32.mrf.mxu1  ;;  %v1516_v43 = vmax.f32 %v1452_v40, 0.0  ;;  %2445 = vmatmul.msk.bf16.gmra.mxu3 %vm781_vm0, %v419_v18  ;;  %v366_v40 = vld [vmem:[%s2588_s29 + $0x98] sm:$0xff] }
  0xb6   : > { %2413 = vmatmul.msk.bf16.gmra.mxu2 %vm781_vm0, %v419_v18  ;;  %2381 = vmatmul.msk.bf16.gmra.mxu1 %vm781_vm0, %v419_v18  ;;  %v420_v44 = vpack.c.bf16 %v366_v40, %v365_v39 }
  0xb7   : > { %v1584_v47 = vmul.f32 %v2646_v55, %v1516_v43 }
  0xb8   : > { %v591_v19 = vpop.f32.mrf.mxu0  ;;  %v2676_v29 = vpop.f32.mrf.mxu3 }
  0xb9   : > { %v1389_v21 = vmul.f32 %v897_v20, %v591_v19  ;;  %v1066_v22 = vpop.f32.mrf.mxu2 }
  0xbb   : > { %v1453_v23 = vadd.f32 %v1389_v21, %v1066_v22 }
  0xbd   : > { %v1517_v25 = vmax.f32 %v1453_v23, 0.0  ;;  %v899_v46 = vpop.f32.mrf.mxu1 }
  0xbf   : > { %v1585_v27 = vmul.f32 %v2646_v55, %v1517_v25 }
  0xc0   : > { %v2684_v34 = vpop.f32.mrf.mxu3  ;;  %v593_v45 = vpop.f32.mrf.mxu0 }
  0xc1   : > { %v1068_v48 = vpop.f32.mrf.mxu2  ;;  %v1390_v52 = vmul.f32 %v899_v46, %v593_v45 }
  0xc3   : > { %1649 = vadd.xlane.f32.xlu1 %v1583_v14  ;;  %v1454_v56 = vadd.f32 %v1390_v52, %v1068_v48  ;;  %v267_v52 = vld [vmem:[%s2599_s8 + $0x80] sm:$0xff] }
  0xc5   : > { %v902_v49 = vpop.f32.mrf.mxu1  ;;  %v1518_v59 = vmax.f32 %v1454_v56, 0.0  ;;  %2446 = vmatmul.msk.bf16.gmra.mxu3 %vm781_vm0, %v420_v44 }
  0xc6   : > { %2414 = vmatmul.msk.bf16.gmra.mxu2 %vm781_vm0, %v420_v44  ;;  %2382 = vmatmul.msk.bf16.gmra.mxu1 %vm781_vm0, %v420_v44 }
  0xc7   : > { %v1586_v1 = vmul.f32 %v2646_v55, %v1518_v59  ;;  %v270_v59 = vld [vmem:[%s2599_s8 + $0x98] sm:$0xff] }
  0xc8   : > { %v2689_v38 = vpop.f32.mrf.mxu3  ;;  %v596_v51 = vpop.f32.mrf.mxu0 }
  0xc9   : > { %v1391_v53 = vmul.f32 %v902_v49, %v596_v51  ;;  %v1071_v54 = vpop.f32.mrf.mxu2 }
  0xcb   : > { %v1455_v58 = vadd.f32 %v1391_v53, %v1071_v54  ;;  %v268_v53 = vld [vmem:[%s2599_s8 + $0x88] sm:$0xff] }
  0xcc   : > { %v323_v54 = vpack.c.bf16 %v268_v53, %v267_v52 }
  0xcd   : > { %v1519_v62 = vmax.f32 %v1455_v58, 0.0  ;;  %v904_v13 = vpop.f32.mrf.mxu1  ;;  %v269_v58 = vld [vmem:[%s2599_s8 + $0x90] sm:$0xff] }
  0xce   : > { %2325 = vmatmul.msk.bf16.gmra.mxu0 %vm475_vm1, %v323_v54 }
  0xcf   : > { %v1587_v3 = vmul.f32 %v2646_v55, %v1519_v62 }
  0xd0   : > { %v2712_v4 = vpop.f32.mrf.mxu3  ;;  %v598_v14 = vpop.f32.mrf.mxu0 }
  0xd1   : > { %v1392_v19 = vmul.f32 %v904_v13, %v598_v14  ;;  %v1073_v20 = vpop.f32.mrf.mxu2  ;;  %v367_v13 = vld [vmem:[%s2588_s29 + $0xa0] sm:$0xff]  ;;  %v368_v14 = vld [vmem:[%s2588_s29 + $0xa8] sm:$0xff] }
  0xd2   : > { %v421_v16 = vpack.c.bf16 %v368_v14, %v367_v13 }
  0xd3   : > { %v1456_v22 = vadd.f32 %v1392_v19, %v1073_v20 }
  0xd5   : > { %v907_v23 = vpop.f32.mrf.mxu1  ;;  %v1520_v24 = vmax.f32 %v1456_v22, 0.0  ;;  %2447 = vmatmul.msk.bf16.gmra.mxu3 %vm781_vm0, %v421_v16 }
  0xd6   : > { %2415 = vmatmul.msk.bf16.gmra.mxu2 %vm781_vm0, %v421_v16  ;;  %2383 = vmatmul.msk.bf16.gmra.mxu1 %vm781_vm0, %v421_v16 }
  0xd9   : > { %v1076_v25 = vpop.f32.mrf.mxu2 }
  0xda   : > { %1653 = vadd.xlane.f32.xlu2 %v1585_v27  ;;  %v1588_v27 = vmul.f32 %v2646_v55, %v1520_v24 }
  0xdc   : > { %1909 = vrot.lane.b32.xlu1 %v2676_v29, %s2501_s11 }
  0xdd   : > { %v909_v28 = vpop.f32.mrf.mxu1 }
  0xdf   : > { %1647 = vadd.xlane.f32.xlu0 %v1582_v33 }
  0xe1   : > { %v1078_v35 = vpop.f32.mrf.mxu2 }
  0xf2   : > { %1913 = vrot.lane.b32.xlu2 %v2689_v38, %s2501_s11 }
  0xf3   : > { %1911 = vrot.lane.b32.xlu0 %v2684_v34, %s2501_s11 }
  0xfb   : > { %v1904_v21 = vpop.permute.xlu2 %1903 }
 0x106   : > { %1651 = vadd.xlane.f32.xlu1 %v1584_v47 }
 0x10b   : > { %v1902_v63 = vpop.permute.xlu1 %1901  ;;  %v1908_v26 = vpop.permute.xlu2 %1907 }
 0x114   : > { %v1646_v60 = vpop.xlane.xlu0 %1645 }
 0x115   : > { %v1773_v61 = vmul.f32 %v1646_v60, %v2639_v50  ;;  %v2716_v50 = vpop.f32.mrf.mxu3  ;;  %v324_v60 = vpack.c.bf16 %v270_v59, %v269_v58 }
 0x117   : > { %v2093_v0 = vadd.f32 %v1902_v63, %v1773_v61  ;;  %2326 = vmatmul.msk.bf16.gmra.mxu0 %vm475_vm1, %v324_v60  ;;  %v912_v63 = vpop.f32.mrf.mxu1 }
 0x119   : > { %2158 = vst.msk [vmem:[%s2706_s16] sm:$0xff] %vm2157_vm2, %v2093_v0 }
 0x11b   : > { %1655 = vadd.xlane.f32.xlu2 %v1586_v1  ;;  %v1081_v1 = vpop.f32.mrf.mxu2 }
 0x11d   : > { %1657 = vadd.xlane.f32.xlu0 %v1587_v3  ;;  %v2721_v9 = vpop.f32.mrf.mxu3 }
 0x11f   : > { %1915 = vrot.lane.b32.xlu1 %v2712_v4, %s2501_s11 }
 0x125   : > { %v2751_v56 = vpop.f32.mrf.mxu3 }
 0x127   : > { %v1906_v11 = vpop.permute.xlu0 %1905 }
 0x131   : > { %1917 = vrot.lane.b32.xlu0 %v2716_v50, %s2501_s11 }
 0x133   : > { %1919 = vrot.lane.b32.xlu2 %v2721_v9, %s2501_s11 }
 0x136   : > { %v1650_v10 = vpop.xlane.xlu1 %1649 }
 0x137   : > { %v1775_v12 = vmul.f32 %v1650_v10, %v2660_v2  ;;  %v601_v2 = vpop.f32.mrf.mxu0  ;;  %v914_v10 = vpop.f32.mrf.mxu1 }
 0x138   : > { %v1393_v31 = vmul.f32 %v907_v23, %v601_v2 }
 0x139   : > { %v2095_v17 = vadd.f32 %v1906_v11, %v1775_v12  ;;  %v1083_v12 = vpop.f32.mrf.mxu2 }
 0x13a   : > { %v1457_v41 = vadd.f32 %v1393_v31, %v1076_v25 }
 0x13b   : > { %2160 = vst.msk [vmem:[%s2706_s16 + $0x10] sm:$0xff] %vm2157_vm2, %v2095_v17 }
 0x13f   : > { %v603_v30 = vpop.f32.mrf.mxu0  ;;  %v917_v18 = vpop.f32.mrf.mxu1 }
 0x140   : > { %v1394_v32 = vmul.f32 %v909_v28, %v603_v30 }
 0x141   : > { %v1086_v22 = vpop.f32.mrf.mxu2 }
 0x142   : > { %v1458_v43 = vadd.f32 %v1394_v32, %v1078_v35 }
 0x144   : > { %v1522_v47 = vmax.f32 %v1458_v43, 0.0 }
 0x146   : > { %v1590_v51 = vmul.f32 %v2646_v55, %v1522_v47 }
 0x147   : > { %v606_v62 = vpop.f32.mrf.mxu0 }
 0x148   : > { %v1395_v7 = vmul.f32 %v912_v63, %v606_v62 }
 0x149   : > { %1659 = vadd.xlane.f32.xlu1 %v1588_v27 }
 0x14a   : > { %v1459_v11 = vadd.f32 %v1395_v7, %v1081_v1 }
 0x14c   : > { %v1523_v15 = vmax.f32 %v1459_v11, 0.0 }
 0x14d   : > { %v1654_v33 = vpop.xlane.xlu2 %1653 }
 0x14e   : > { %v1777_v36 = vmul.f32 %v1654_v33, %v2676_v29  ;;  %v1910_v37 = vpop.permute.xlu1 %1909  ;;  %v1521_v29 = vmax.f32 %v1457_v41, 0.0 }
 0x14f   : > { %v608_v8 = vpop.f32.mrf.mxu0 }
 0x150   : > { %v2097_v42 = vadd.f32 %v1910_v37, %v1777_v36  ;;  %v1589_v49 = vmul.f32 %v2646_v55, %v1521_v29  ;;  %v1396_v24 = vmul.f32 %v914_v10, %v608_v8  ;;  %v271_v37 = vld [vmem:[%s2599_s8 + $0xa0] sm:$0xff]  ;;  %v369_v29 = vld [vmem:[%s2588_s29 + $0xb0] sm:$0xff]  ;;  %v372_v10 = vld [vmem:[%s2588_s29 + $0xc8] sm:$0xff] }
 0x151   : > { %v371_v8 = vld [vmem:[%s2588_s29 + $0xc0] sm:$0xff] }
 0x152   : > { %2162 = vst.msk [vmem:[%s2706_s16 + $0x20] sm:$0xff] %vm2157_vm2, %v2097_v42  ;;  %v1648_v45 = vpop.xlane.xlu0 %1647  ;;  %v1460_v31 = vadd.f32 %v1396_v24, %v1083_v12  ;;  %v919_v42 = vpop.f32.mrf.mxu1  ;;  %v275_v24 = vld [vmem:[%s2599_s8 + $0xc0] sm:$0xff] }
 0x153   : > { %v1774_v46 = vmul.f32 %v1648_v45, %v2648_v57  ;;  %v2756_v57 = vpop.f32.mrf.mxu3  ;;  %v1088_v45 = vpop.f32.mrf.mxu2 }
 0x154   : > { %v1524_v35 = vmax.f32 %v1460_v31, 0.0 }
 0x155   : > { %v2094_v48 = vadd.f32 %v1904_v21, %v1774_v46  ;;  %v1914_v17 = vpop.permute.xlu2 %1913  ;;  %v370_v46 = vld [vmem:[%s2588_s29 + $0xb8] sm:$0xff] }
 0x156   : > { %v1592_v36 = vmul.f32 %v2646_v55, %v1524_v35  ;;  %v422_v47 = vpack.c.bf16 %v370_v46, %v369_v29 }
 0x157   : > { %2159 = vst.msk [vmem:[%s2706_s16 + $0x8] sm:$0xff] %vm2157_vm2, %v2094_v48  ;;  %v611_v19 = vpop.f32.mrf.mxu0 }
 0x158   : > { %v1397_v21 = vmul.f32 %v917_v18, %v611_v19  ;;  %2448 = vmatmul.msk.bf16.gmra.mxu3 %vm781_vm0, %v422_v47  ;;  %2416 = vmatmul.msk.bf16.gmra.mxu2 %vm781_vm0, %v422_v47 }
 0x159   : > { %2384 = vmatmul.msk.bf16.gmra.mxu1 %vm781_vm0, %v422_v47 }
 0x15a   : > { %v1461_v23 = vadd.f32 %v1397_v21, %v1086_v22  ;;  %v274_v22 = vld [vmem:[%s2599_s8 + $0xb8] sm:$0xff] }
 0x15b   : > { %1663 = vadd.xlane.f32.xlu0 %v1590_v51  ;;  %v2763_v61 = vpop.f32.mrf.mxu3  ;;  %v1091_v54 = vpop.f32.mrf.mxu2 }
 0x15c   : > { %1661 = vadd.xlane.f32.xlu2 %v1589_v49  ;;  %v1525_v30 = vmax.f32 %v1461_v23, 0.0  ;;  %v922_v49 = vpop.f32.mrf.mxu1 }
 0x15e   : > { %v1593_v33 = vmul.f32 %v2646_v55, %v1525_v30 }
 0x15f   : > { %v613_v41 = vpop.f32.mrf.mxu0 }
 0x160   : > { %v1398_v58 = vmul.f32 %v919_v42, %v613_v41  ;;  %v374_v41 = vld [vmem:[%s2588_s29 + $0xd8] sm:$0xff] }
 0x162   : > { %1921 = vrot.lane.b32.xlu1 %v2751_v56, %s2501_s11  ;;  %v1462_v59 = vadd.f32 %v1398_v58, %v1088_v45 }
 0x164   : > { %v924_v60 = vpop.f32.mrf.mxu1 }
 0x165   : > { %v1912_v20 = vpop.permute.xlu0 %1911 }
 0x167   : > { %v616_v48 = vpop.f32.mrf.mxu0 }
 0x168   : > { %v1399_v12 = vmul.f32 %v922_v49, %v616_v48 }
 0x16a   : > { %v1463_v18 = vadd.f32 %v1399_v12, %v1091_v54 }
 0x16c   : > { %v1527_v21 = vmax.f32 %v1463_v18, 0.0  ;;  %v927_v30 = vpop.f32.mrf.mxu1  ;;  %v375_v18 = vld [vmem:[%s2588_s29 + $0xe0] sm:$0xff] }
 0x16f   : > { %1923 = vrot.lane.b32.xlu0 %v2756_v57, %s2501_s11  ;;  %v618_v62 = vpop.f32.mrf.mxu0 }
 0x170   : > { %v1400_v1 = vmul.f32 %v924_v60, %v618_v62 }
 0x174   : > { %1925 = vrot.lane.b32.xlu2 %v2763_v61, %s2501_s11 }
 0x179   : > { %v1652_v0 = vpop.xlane.xlu1 %1651 }
 0x17a   : > { %v1776_v3 = vmul.f32 %v1652_v0, %v2663_v5  ;;  %v1591_v5 = vmul.f32 %v2646_v55, %v1523_v15 }
 0x17c   : > { %v2096_v6 = vadd.f32 %v1908_v26, %v1776_v3  ;;  %v1526_v3 = vmax.f32 %v1462_v59, 0.0 }
 0x17e   : > { %2161 = vst.msk [vmem:[%s2706_s16 + $0x18] sm:$0xff] %vm2157_vm2, %v2096_v6  ;;  %v1093_v6 = vpop.f32.mrf.mxu2  ;;  %v1594_v11 = vmul.f32 %v2646_v55, %v1526_v3 }
 0x17f   : > { %v1464_v7 = vadd.f32 %v1400_v1, %v1093_v6 }
 0x18c   : > { %1665 = vadd.xlane.f32.xlu1 %v1591_v5 }
 0x18e   : > { %v1656_v2 = vpop.xlane.xlu2 %1655 }
 0x18f   : > { %v1778_v25 = vmul.f32 %v1656_v2, %v2684_v34  ;;  %v2784_v34 = vpop.f32.mrf.mxu3  ;;  %v1595_v2 = vmul.f32 %v2646_v55, %v1527_v21 }
 0x190   : > { %v1658_v27 = vpop.xlane.xlu0 %1657 }
 0x191   : > { %v2098_v26 = vadd.f32 %v1912_v20, %v1778_v25  ;;  %v1779_v28 = vmul.f32 %v1658_v27, %v2689_v38  ;;  %v272_v38 = vld [vmem:[%s2599_s8 + $0xa8] sm:$0xff]  ;;  %v1916_v44 = vpop.permute.xlu1 %1915 }
 0x192   : > { %v325_v39 = vpack.c.bf16 %v272_v38, %v271_v37  ;;  %v276_v25 = vld [vmem:[%s2599_s8 + $0xc8] sm:$0xff] }
 0x193   : > { %2163 = vst.msk [vmem:[%s2706_s16 + $0x28] sm:$0xff] %vm2157_vm2, %v2098_v26  ;;  %v2099_v32 = vadd.f32 %v1914_v17, %v1779_v28  ;;  %v1528_v17 = vmax.f32 %v1464_v7, 0.0  ;;  %v327_v26 = vpack.c.bf16 %v276_v25, %v275_v24  ;;  %v621_v28 = vpop.f32.mrf.mxu0 }
 0x194   : > { %2327 = vmatmul.msk.bf16.gmra.mxu0 %vm475_vm1, %v325_v39  ;;  %v373_v39 = vld [vmem:[%s2588_s29 + $0xd0] sm:$0xff]  ;;  %v1401_v45 = vmul.f32 %v927_v30, %v621_v28 }
 0x195   : > { %2164 = vst.msk [vmem:[%s2706_s16 + $0x30] sm:$0xff] %vm2157_vm2, %v2099_v32  ;;  %v1596_v20 = vmul.f32 %v2646_v55, %v1528_v17  ;;  %v1096_v32 = vpop.f32.mrf.mxu2 }
 0x196   : > { %v1920_v63 = vpop.permute.xlu2 %1919  ;;  %v1465_v49 = vadd.f32 %v1401_v45, %v1096_v32  ;;  %v378_v45 = vld [vmem:[%s2588_s29 + $0xf8] sm:$0xff] }
 0x197   : > { %v2791_v40 = vpop.f32.mrf.mxu3 }
 0x199   : > { %1669 = vadd.xlane.f32.xlu0 %v1593_v33 }
 0x19b   : > { %v623_v35 = vpop.f32.mrf.mxu0 }
 0x19d   : > { %1667 = vadd.xlane.f32.xlu2 %v1592_v36  ;;  %v929_v36 = vpop.f32.mrf.mxu1  ;;  %v1098_v37 = vpop.f32.mrf.mxu2 }
 0x19e   : > { %v1402_v1 = vmul.f32 %v929_v36, %v623_v35 }
 0x19f   : > { %v2795_v43 = vpop.f32.mrf.mxu3 }
 0x1a3   : > { %v1918_v0 = vpop.permute.xlu0 %1917  ;;  %v626_v47 = vpop.f32.mrf.mxu0 }
 0x1a5   : > { %1927 = vrot.lane.b32.xlu1 %v2784_v34, %s2501_s11  ;;  %v932_v46 = vpop.f32.mrf.mxu1 }
 0x1a7   : > { %v2824_v23 = vpop.f32.mrf.mxu3 }
 0x1ad   : > { %1929 = vrot.lane.b32.xlu0 %v2791_v40, %s2501_s11 }
 0x1af   : > { %v2831_v27 = vpop.f32.mrf.mxu3 }
 0x1b5   : > { %1931 = vrot.lane.b32.xlu2 %v2795_v43, %s2501_s11 }
 0x1b7   : > { %v2835_v31 = vpop.f32.mrf.mxu3 }
 0x1bc   : > { %v1660_v51 = vpop.xlane.xlu1 %1659 }
 0x1bd   : > { %v1780_v52 = vmul.f32 %v1660_v51, %v2712_v4  ;;  %v423_v4 = vpack.c.bf16 %v372_v10, %v371_v8  ;;  %v1403_v51 = vmul.f32 %v932_v46, %v626_v47  ;;  %v1466_v8 = vadd.f32 %v1402_v1, %v1098_v37 }
 0x1bf   : > { %v2100_v53 = vadd.f32 %v1916_v44, %v1780_v52  ;;  %2449 = vmatmul.msk.bf16.gmra.mxu3 %vm781_vm0, %v423_v4  ;;  %2417 = vmatmul.msk.bf16.gmra.mxu2 %vm781_vm0, %v423_v4  ;;  %v424_v44 = vpack.c.bf16 %v374_v41, %v373_v39  ;;  %v1101_v52 = vpop.f32.mrf.mxu2 }
 0x1c0   : > { %2385 = vmatmul.msk.bf16.gmra.mxu1 %vm781_vm0, %v423_v4  ;;  %v1467_v54 = vadd.f32 %v1403_v51, %v1101_v52  ;;  %v277_v4 = vld [vmem:[%s2599_s8 + $0xd0] sm:$0xff] }
 0x1c1   : > { %2165 = vst.msk [vmem:[%s2706_s16 + $0x38] sm:$0xff] %vm2157_vm2, %v2100_v53 }
 0x1c2   : > { %v1531_v60 = vmax.f32 %v1467_v54, 0.0 }
 0x1c4   : > { %v1599_v6 = vmul.f32 %v2646_v55, %v1531_v60 }
 0x1ce   : > { %v1664_v14 = vpop.xlane.xlu0 %1663 }
 0x1cf   : > { %v1662_v13 = vpop.xlane.xlu2 %1661  ;;  %1671 = vadd.xlane.f32.xlu1 %v1594_v11  ;;  %v1782_v16 = vmul.f32 %v1664_v14, %v2721_v9  ;;  %2450 = vmatmul.msk.bf16.gmra.mxu3 %vm781_vm0, %v424_v44  ;;  %v2856_v11 = vpop.f32.mrf.mxu3 }
 0x1d0   : > { %v1781_v15 = vmul.f32 %v1662_v13, %v2716_v50  ;;  %v273_v50 = vld [vmem:[%s2599_s8 + $0xb0] sm:$0xff]  ;;  %2418 = vmatmul.msk.bf16.gmra.mxu2 %vm781_vm0, %v424_v44  ;;  %2386 = vmatmul.msk.bf16.gmra.mxu1 %vm781_vm0, %v424_v44  ;;  %v628_v14 = vpop.f32.mrf.mxu0 }
 0x1d1   : > { %v2102_v5 = vadd.f32 %v1920_v63, %v1782_v16  ;;  %v326_v9 = vpack.c.bf16 %v274_v22, %v273_v50  ;;  %v1103_v16 = vpop.f32.mrf.mxu2  ;;  %v377_v44 = vld [vmem:[%s2588_s29 + $0xf0] sm:$0xff] }
 0x1d2   : > { %v2101_v19 = vadd.f32 %v1918_v0, %v1781_v15  ;;  %v934_v15 = vpop.f32.mrf.mxu1 }
 0x1d3   : > { %2167 = vst.msk [vmem:[%s2706_s16 + $0x48] sm:$0xff] %vm2157_vm2, %v2102_v5  ;;  %2328 = vmatmul.msk.bf16.gmra.mxu0 %vm475_vm1, %v326_v9 }
 0x1d4   : > { %2166 = vst.msk [vmem:[%s2706_s16 + $0x40] sm:$0xff] %vm2157_vm2, %v2101_v19  ;;  %v1922_v33 = vpop.permute.xlu1 %1921  ;;  %v376_v19 = vld [vmem:[%s2588_s29 + $0xe8] sm:$0xff] }
 0x1d5   : > { %v425_v21 = vpack.c.bf16 %v376_v19, %v375_v18 }
 0x1d7   : > { %1675 = vadd.xlane.f32.xlu0 %v1596_v20  ;;  %v1926_v53 = vpop.permute.xlu2 %1925  ;;  %v2861_v13 = vpop.f32.mrf.mxu3 }
 0x1d9   : > { %v1106_v22 = vpop.f32.mrf.mxu2 }
 0x1da   : > { %v937_v20 = vpop.f32.mrf.mxu1 }
 0x1de   : > { %1673 = vadd.xlane.f32.xlu2 %v1595_v2 }
 0x1df   : > { %v2867_v17 = vpop.f32.mrf.mxu3  ;;  %2451 = vmatmul.msk.bf16.gmra.mxu3 %vm781_vm0, %v425_v21 }
 0x1e0   : > { %2419 = vmatmul.msk.bf16.gmra.mxu2 %vm781_vm0, %v425_v21  ;;  %2387 = vmatmul.msk.bf16.gmra.mxu1 %vm781_vm0, %v425_v21 }
 0x1e1   : > { %v1924_v48 = vpop.permute.xlu0 %1923  ;;  %v1108_v32 = vpop.f32.mrf.mxu2 }
 0x1e2   : > { %v939_v9 = vpop.f32.mrf.mxu1 }
 0x1e3   : > { %2329 = vmatmul.msk.bf16.gmra.mxu0 %vm475_vm1, %v327_v26 }
 0x1e8   : > { %1933 = vrot.lane.b32.xlu1 %v2824_v23, %s2501_s11 }
 0x1eb   : > { %1935 = vrot.lane.b32.xlu0 %v2831_v27, %s2501_s11 }
 0x1f6   : > { %1937 = vrot.lane.b32.xlu2 %v2835_v31, %s2501_s11 }
 0x1ff   : > { %v1666_v38 = vpop.xlane.xlu1 %1665 }
 0x200   : > { %v1783_v42 = vmul.f32 %v1666_v38, %v2751_v56  ;;  %v1529_v56 = vmax.f32 %v1465_v49, 0.0 }
 0x202   : > { %v2103_v29 = vadd.f32 %v1922_v33, %v1783_v42  ;;  %v1597_v62 = vmul.f32 %v2646_v55, %v1529_v56  ;;  %v1404_v33 = vmul.f32 %v934_v15, %v628_v14  ;;  %v280_v56 = vld [vmem:[%s2599_s8 + $0xe8] sm:$0xff] }
 0x204   : > { %2168 = vst.msk [vmem:[%s2706_s16 + $0x50] sm:$0xff] %vm2157_vm2, %v2103_v29  ;;  %v1468_v37 = vadd.f32 %v1404_v33, %v1103_v16 }
 0x206   : > { %v1532_v29 = vmax.f32 %v1468_v37, 0.0 }
 0x208   : > { %v1600_v49 = vmul.f32 %v2646_v55, %v1532_v29 }
 0x20c   : > { %v1670_v58 = vpop.xlane.xlu0 %1669 }
 0x20d   : > { %v1785_v59 = vmul.f32 %v1670_v58, %v2763_v61  ;;  %v1530_v61 = vmax.f32 %v1466_v8, 0.0 }
 0x20f   : > { %v2105_v63 = vadd.f32 %v1926_v53, %v1785_v59  ;;  %v1598_v10 = vmul.f32 %v2646_v55, %v1530_v61  ;;  %v279_v53 = vld [vmem:[%s2599_s8 + $0xe0] sm:$0xff]  ;;  %v2895_v59 = vpop.f32.mrf.mxu3 }
 0x210   : > { %v1668_v0 = vpop.xlane.xlu2 %1667  ;;  %v329_v54 = vpack.c.bf16 %v280_v56, %v279_v53 }
 0x211   : > { %v1784_v3 = vmul.f32 %v1668_v0, %v2756_v57  ;;  %2170 = vst.msk [vmem:[%s2706_s16 + $0x60] sm:$0xff] %vm2157_vm2, %v2105_v63  ;;  %v278_v57 = vld [vmem:[%s2599_s8 + $0xd8] sm:$0xff]  ;;  %v631_v5 = vpop.f32.mrf.mxu0 }
 0x212   : > { %1677 = vadd.xlane.f32.xlu1 %v1597_v62  ;;  %v328_v12 = vpack.c.bf16 %v278_v57, %v277_v4  ;;  %v1405_v46 = vmul.f32 %v937_v20, %v631_v5  ;;  %v281_v62 = vld [vmem:[%s2599_s8 + $0xf0] sm:$0xff]  ;;  %v282_v63 = vld [vmem:[%s2599_s8 + $0xf8] sm:$0xff]  ;;  %v379_v4 = vld [vmem:[%s2588_s29 + $0x100] sm:$0xff] }
 0x213   : > { %v2104_v7 = vadd.f32 %v1924_v48, %v1784_v3  ;;  %v330_v0 = vpack.c.bf16 %v282_v63, %v281_v62  ;;  %v942_v3 = vpop.f32.mrf.mxu1  ;;  %v380_v57 = vld [vmem:[%s2588_s29 + $0x108] sm:$0xff] }
 0x214   : > { %2330 = vmatmul.msk.bf16.gmra.mxu0 %vm475_vm1, %v328_v12  ;;  %v1469_v51 = vadd.f32 %v1405_v46, %v1106_v22  ;;  %v427_v14 = vpack.c.bf16 %v380_v57, %v379_v4 }
 0x215   : > { %2169 = vst.msk [vmem:[%s2706_s16 + $0x58] sm:$0xff] %vm2157_vm2, %v2104_v7  ;;  %1681 = vadd.xlane.f32.xlu0 %v1599_v6  ;;  %v1111_v6 = vpop.f32.mrf.mxu2 }
 0x216   : > { %v1533_v58 = vmax.f32 %v1469_v51, 0.0 }
 0x217   : > { %v1928_v50 = vpop.permute.xlu1 %1927  ;;  %v2898_v60 = vpop.f32.mrf.mxu3 }
 0x218   : > { %v1932_v36 = vpop.permute.xlu2 %1931 }
 0x219   : > { %v633_v2 = vpop.f32.mrf.mxu0 }
 0x21a   : > { %v1406_v28 = vmul.f32 %v939_v9, %v633_v2 }
 0x21b   : > { %v944_v61 = vpop.f32.mrf.mxu1 }
 0x21c   : > { %v1470_v35 = vadd.f32 %v1406_v28, %v1108_v32 }
 0x21e   : > { %v1534_v41 = vmax.f32 %v1470_v35, 0.0 }
 0x21f   : > { %1679 = vadd.xlane.f32.xlu2 %v1598_v10  ;;  %v1930_v25 = vpop.permute.xlu0 %1929  ;;  %v1113_v10 = vpop.f32.mrf.mxu2 }
 0x220   : > { %v1602_v47 = vmul.f32 %v2646_v55, %v1534_v41  ;;  %v284_v41 = vld [vmem:[%s2599_s8 + $0x108] sm:$0xff] }
 0x224   : > { %2331 = vmatmul.msk.bf16.gmra.mxu0 %vm475_vm1, %v329_v54 }
 0x229   : > { %1941 = vrot.lane.b32.xlu0 %v2861_v13, %s2501_s11 }
 0x22b   : > { %1939 = vrot.lane.b32.xlu1 %v2856_v11, %s2501_s11 }
 0x234   : > { %2332 = vmatmul.msk.bf16.gmra.mxu0 %vm475_vm1, %v330_v0 }
 0x237   : > { %1943 = vrot.lane.b32.xlu2 %v2867_v17, %s2501_s11 }
 0x23d   : > { %v947_v15 = vpop.f32.mrf.mxu1 }
 0x242   : > { %v1672_v24 = vpop.xlane.xlu1 %1671  ;;  %v2907_v7 = vpop.f32.mrf.mxu3 }
 0x243   : > { %v1786_v26 = vmul.f32 %v1672_v24, %v2784_v34  ;;  %v426_v34 = vpack.c.bf16 %v378_v45, %v377_v44  ;;  %v1116_v5 = vpop.f32.mrf.mxu2 }
 0x245   : > { %v2106_v30 = vadd.f32 %v1928_v50, %v1786_v26  ;;  %2452 = vmatmul.msk.bf16.gmra.mxu3 %vm781_vm0, %v426_v34  ;;  %2420 = vmatmul.msk.bf16.gmra.mxu2 %vm781_vm0, %v426_v34  ;;  %v949_v46 = vpop.f32.mrf.mxu1 }
 0x246   : > { %2388 = vmatmul.msk.bf16.gmra.mxu1 %vm781_vm0, %v426_v34 }
 0x247   : > { %2171 = vst.msk [vmem:[%s2706_s16 + $0x68] sm:$0xff] %vm2157_vm2, %v2106_v30 }
 0x24a   : > { %v1676_v38 = vpop.xlane.xlu0 %1675  ;;  %v2929_v45 = vpop.f32.mrf.mxu3 }
 0x24b   : > { %v1788_v39 = vmul.f32 %v1676_v38, %v2795_v43 }
 0x24d   : > { %v2108_v42 = vadd.f32 %v1932_v36, %v1788_v39 }
 0x24f   : > { %2173 = vst.msk [vmem:[%s2706_s16 + $0x78] sm:$0xff] %vm2157_vm2, %v2108_v42 }
 0x250   : > { %v636_v1 = vpop.f32.mrf.mxu0 }
 0x251   : > { %v1674_v48 = vpop.xlane.xlu2 %1673  ;;  %v1407_v22 = vmul.f32 %v942_v3, %v636_v1 }
 0x252   : > { %v1787_v43 = vmul.f32 %v1674_v48, %v2791_v40  ;;  %v1601_v40 = vmul.f32 %v2646_v55, %v1533_v58  ;;  %v381_v48 = vld [vmem:[%s2588_s29 + $0x110] sm:$0xff] }
 0x253   : > { %1687 = vadd.xlane.f32.xlu0 %v1602_v47  ;;  %v1471_v28 = vadd.f32 %v1407_v22, %v1111_v6  ;;  %v1118_v47 = vpop.f32.mrf.mxu2 }
 0x254   : > { %v2107_v52 = vadd.f32 %v1930_v25, %v1787_v43  ;;  %v382_v43 = vld [vmem:[%s2588_s29 + $0x118] sm:$0xff] }
 0x255   : > { %1683 = vadd.xlane.f32.xlu1 %v1600_v49  ;;  %2453 = vmatmul.msk.bf16.gmra.mxu3 %vm781_vm0, %v427_v14  ;;  %v952_v49 = vpop.f32.mrf.mxu1 }
 0x256   : > { %2172 = vst.msk [vmem:[%s2706_s16 + $0x70] sm:$0xff] %vm2157_vm2, %v2107_v52  ;;  %2421 = vmatmul.msk.bf16.gmra.mxu2 %vm781_vm0, %v427_v14  ;;  %2389 = vmatmul.msk.bf16.gmra.mxu1 %vm781_vm0, %v427_v14  ;;  %v428_v52 = vpack.c.bf16 %v382_v43, %v381_v48 }
 0x258   : > { %v638_v8 = vpop.f32.mrf.mxu0 }
 0x259   : > { %v1938_v24 = vpop.permute.xlu2 %1937  ;;  %v1408_v35 = vmul.f32 %v944_v61, %v638_v8 }
 0x25a   : > { %v1934_v12 = vpop.permute.xlu1 %1933 }
 0x25b   : > { %v1472_v39 = vadd.f32 %v1408_v35, %v1113_v10  ;;  %v1121_v56 = vpop.f32.mrf.mxu2 }
 0x25d   : > { %v1936_v18 = vpop.permute.xlu0 %1935  ;;  %v1536_v44 = vmax.f32 %v1472_v39, 0.0  ;;  %v954_v58 = vpop.f32.mrf.mxu1 }
 0x25f   : > { %v1604_v29 = vmul.f32 %v2646_v55, %v1536_v44  ;;  %v386_v44 = vld [vmem:[%s2588_s29 + $0x138] sm:$0xff] }
 0x260   : > { %1685 = vadd.xlane.f32.xlu2 %v1601_v40  ;;  %v641_v16 = vpop.f32.mrf.mxu0 }
 0x261   : > { %v1409_v19 = vmul.f32 %v947_v15, %v641_v16 }
 0x263   : > { %v1473_v50 = vadd.f32 %v1409_v19, %v1116_v5  ;;  %v1123_v0 = vpop.f32.mrf.mxu2  ;;  %v286_v19 = vld [vmem:[%s2599_s8 + $0x118] sm:$0xff] }
 0x265   : > { %v1537_v26 = vmax.f32 %v1473_v50, 0.0  ;;  %2454 = vmatmul.msk.bf16.gmra.mxu3 %vm781_vm0, %v428_v52  ;;  %v384_v50 = vld [vmem:[%s2588_s29 + $0x128] sm:$0xff] }
 0x266   : > { %2422 = vmatmul.msk.bf16.gmra.mxu2 %vm781_vm0, %v428_v52  ;;  %2390 = vmatmul.msk.bf16.gmra.mxu1 %vm781_vm0, %v428_v52 }
 0x267   : > { %1947 = vrot.lane.b32.xlu0 %v2898_v60, %s2501_s11  ;;  %v1605_v32 = vmul.f32 %v2646_v55, %v1537_v26 }
 0x268   : > { %v643_v34 = vpop.f32.mrf.mxu0 }
 0x269   : > { %v1410_v15 = vmul.f32 %v949_v46, %v643_v34 }
 0x26b   : > { %v1474_v16 = vadd.f32 %v1410_v15, %v1118_v47 }
 0x26d   : > { %v1538_v22 = vmax.f32 %v1474_v16, 0.0 }
 0x26e   : > { %1945 = vrot.lane.b32.xlu1 %v2895_v59, %s2501_s11 }
 0x278   : > { %1949 = vrot.lane.b32.xlu2 %v2907_v7, %s2501_s11 }
 0x285   : > { %v1678_v20 = vpop.xlane.xlu1 %1677 }
 0x286   : > { %v1789_v21 = vmul.f32 %v1678_v20, %v2824_v23  ;;  %v1535_v23 = vmax.f32 %v1471_v28, 0.0 }
 0x288   : > { %v2109_v9 = vadd.f32 %v1934_v12, %v1789_v21  ;;  %v1682_v2 = vpop.xlane.xlu0 %1681  ;;  %v1603_v37 = vmul.f32 %v2646_v55, %v1535_v23  ;;  %v383_v21 = vld [vmem:[%s2588_s29 + $0x120] sm:$0xff] }
 0x289   : > { %v1791_v25 = vmul.f32 %v1682_v2, %v2835_v31  ;;  %v283_v31 = vld [vmem:[%s2599_s8 + $0x100] sm:$0xff] }
 0x28a   : > { %2174 = vst.msk [vmem:[%s2706_s16 + $0x80] sm:$0xff] %vm2157_vm2, %v2109_v9  ;;  %v331_v42 = vpack.c.bf16 %v284_v41, %v283_v31 }
 0x28b   : > { %v2111_v30 = vadd.f32 %v1938_v24, %v1791_v25 }
 0x28c   : > { %2333 = vmatmul.msk.bf16.gmra.mxu0 %vm475_vm1, %v331_v42  ;;  %v385_v42 = vld [vmem:[%s2588_s29 + $0x130] sm:$0xff] }
 0x28d   : > { %2176 = vst.msk [vmem:[%s2706_s16 + $0x90] sm:$0xff] %vm2157_vm2, %v2111_v30  ;;  %v287_v30 = vld [vmem:[%s2599_s8 + $0x120] sm:$0xff] }
 0x291   : > { %1693 = vadd.xlane.f32.xlu0 %v1605_v32  ;;  %v646_v51 = vpop.f32.mrf.mxu0  ;;  %v288_v32 = vld [vmem:[%s2599_s8 + $0x128] sm:$0xff] }
 0x292   : > { %v1680_v33 = vpop.xlane.xlu2 %1679 }
 0x293   : > { %v1790_v36 = vmul.f32 %v1680_v33, %v2831_v27  ;;  %v2933_v27 = vpop.f32.mrf.mxu3  ;;  %v333_v33 = vpack.c.bf16 %v288_v32, %v287_v30 }
 0x295   : > { %v2110_v38 = vadd.f32 %v1936_v18, %v1790_v36  ;;  %v1411_v18 = vmul.f32 %v952_v49, %v646_v51  ;;  %v957_v36 = vpop.f32.mrf.mxu1 }
 0x297   : > { %2175 = vst.msk [vmem:[%s2706_s16 + $0x88] sm:$0xff] %vm2157_vm2, %v2110_v38  ;;  %v1475_v9 = vadd.f32 %v1411_v18, %v1121_v56 }
 0x298   : > { %1689 = vadd.xlane.f32.xlu1 %v1603_v37  ;;  %v1126_v37 = vpop.f32.mrf.mxu2 }
 0x299   : > { %v648_v40 = vpop.f32.mrf.mxu0  ;;  %v1539_v26 = vmax.f32 %v1475_v9, 0.0 }
 0x29a   : > { %v1412_v63 = vmul.f32 %v954_v58, %v648_v40  ;;  %v1944_v10 = vpop.permute.xlu2 %1943 }
 0x29b   : > { %v2943_v53 = vpop.f32.mrf.mxu3  ;;  %v1942_v54 = vpop.permute.xlu0 %1941 }
 0x29c   : > { %v1476_v1 = vadd.f32 %v1412_v63, %v1123_v0 }
 0x29d   : > { %v1940_v62 = vpop.permute.xlu1 %1939  ;;  %v959_v39 = vpop.f32.mrf.mxu1 }
 0x29e   : > { %v1540_v61 = vmax.f32 %v1476_v1, 0.0 }
 0x2a0   : > { %v1608_v14 = vmul.f32 %v2646_v55, %v1540_v61  ;;  %v429_v55 = vpack.c.bf16 %v384_v50, %v383_v21  ;;  %v1128_v31 = vpop.f32.mrf.mxu2  ;;  %v388_v21 = vld [vmem:[%s2588_s29 + $0x148] sm:$0xff] }
 0x2a1   : > { %1691 = vadd.xlane.f32.xlu2 %v1604_v29  ;;  %v651_v35 = vpop.f32.mrf.mxu0  ;;  %v430_v29 = vpack.c.bf16 %v386_v44, %v385_v42  ;;  %v291_v42 = vld [vmem:[%s2599_s8 + $0x140] sm:$0xff]  ;;  %v292_v44 = vld [vmem:[%s2599_s8 + $0x148] sm:$0xff] }
 0x2a2   : > { %2455 = vmatmul.msk.bf16.gmra.mxu3 %vm781_vm0, %v429_v55  ;;  %2423 = vmatmul.msk.bf16.gmra.mxu2 %vm781_vm0, %v429_v55  ;;  %v1413_v1 = vmul.f32 %v957_v36, %v651_v35 }
 0x2a3   : > { %v2961_v24 = vpop.f32.mrf.mxu3  ;;  %2391 = vmatmul.msk.bf16.gmra.mxu1 %vm781_vm0, %v429_v55 }
 0x2a5   : > { %1953 = vrot.lane.b32.xlu0 %v2933_v27, %s2501_s11 }
 0x2a9   : > { %v653_v38 = vpop.f32.mrf.mxu0 }
 0x2ab   : > { %v2977_v23 = vpop.f32.mrf.mxu3 }
 0x2b1   : > { %1951 = vrot.lane.b32.xlu1 %v2929_v45, %s2501_s11  ;;  %v656_v46 = vpop.f32.mrf.mxu0 }
 0x2b2   : > { %2456 = vmatmul.msk.bf16.gmra.mxu3 %vm781_vm0, %v430_v29  ;;  %2424 = vmatmul.msk.bf16.gmra.mxu2 %vm781_vm0, %v430_v29 }
 0x2b3   : > { %2392 = vmatmul.msk.bf16.gmra.mxu1 %vm781_vm0, %v430_v29  ;;  %v389_v29 = vld [vmem:[%s2588_s29 + $0x150] sm:$0xff] }
 0x2b9   : > { %1955 = vrot.lane.b32.xlu2 %v2943_v53, %s2501_s11 }
 0x2c3   : > { %v962_v34 = vpop.f32.mrf.mxu1 }
 0x2c4   : > { %v1415_v48 = vmul.f32 %v962_v34, %v656_v46  ;;  %v335_v34 = vpack.c.bf16 %v292_v44, %v291_v42  ;;  %v390_v46 = vld [vmem:[%s2588_s29 + $0x158] sm:$0xff] }
 0x2c6   : > { %v1688_v3 = vpop.xlane.xlu0 %1687 }
 0x2c7   : > { %v1794_v8 = vmul.f32 %v1688_v3, %v2867_v17  ;;  %v285_v17 = vld [vmem:[%s2599_s8 + $0x110] sm:$0xff] }
 0x2c8   : > { %v1684_v6 = vpop.xlane.xlu1 %1683  ;;  %v332_v20 = vpack.c.bf16 %v286_v19, %v285_v17  ;;  %v2984_v41 = vpop.f32.mrf.mxu3 }
 0x2c9   : > { %v1792_v4 = vmul.f32 %v1684_v6, %v2856_v11  ;;  %v2114_v57 = vadd.f32 %v1944_v10, %v1794_v8  ;;  %v1131_v43 = vpop.f32.mrf.mxu2  ;;  %v1477_v6 = vadd.f32 %v1413_v1, %v1126_v37  ;;  %v1414_v8 = vmul.f32 %v959_v39, %v653_v38  ;;  %v658_v19 = vpop.f32.mrf.mxu0 }
 0x2ca   : > { %2334 = vmatmul.msk.bf16.gmra.mxu0 %vm475_vm1, %v332_v20  ;;  %v1479_v49 = vadd.f32 %v1415_v48, %v1131_v43  ;;  %v432_v48 = vpack.c.bf16 %v390_v46, %v389_v29 }
 0x2cb   : > { %v2112_v12 = vadd.f32 %v1940_v62, %v1792_v4  ;;  %2179 = vst.msk [vmem:[%s2706_s16 + $0xa8] sm:$0xff] %vm2157_vm2, %v2114_v57  ;;  %v1541_v4 = vmax.f32 %v1477_v6, 0.0  ;;  %v1478_v15 = vadd.f32 %v1414_v8, %v1128_v31 }
 0x2cd   : > { %2177 = vst.msk [vmem:[%s2706_s16 + $0x98] sm:$0xff] %vm2157_vm2, %v2112_v12  ;;  %v289_v12 = vld [vmem:[%s2599_s8 + $0x130] sm:$0xff]  ;;  %v1542_v18 = vmax.f32 %v1478_v15, 0.0  ;;  %v391_v15 = vld [vmem:[%s2588_s29 + $0x160] sm:$0xff] }
 0x2cf   : > { %1699 = vadd.xlane.f32.xlu0 %v1608_v14  ;;  %v290_v14 = vld [vmem:[%s2599_s8 + $0x138] sm:$0xff] }
 0x2d0   : > { %v3001_v10 = vpop.f32.mrf.mxu3 }
 0x2d1   : > { %v1133_v20 = vpop.f32.mrf.mxu2 }
 0x2d3   : > { %v1686_v5 = vpop.xlane.xlu2 %1685 }
 0x2d4   : > { %v1793_v11 = vmul.f32 %v1686_v5, %v2861_v13  ;;  %v2971_v13 = vld [vmem:[%s3419_s4] ss:$0 sm:$0xff]  ;;  %v964_v5 = vpop.f32.mrf.mxu1 }
 0x2d5   : > { %v1606_v25 = vmul.f32 %v2971_v13, %v1538_v22  ;;  %v1607_v28 = vmul.f32 %v2971_v13, %v1539_v26  ;;  %v1609_v16 = vmul.f32 %v2971_v13, %v1541_v4 }
 0x2d6   : > { %v2113_v2 = vadd.f32 %v1942_v54, %v1793_v11  ;;  %v1543_v54 = vmax.f32 %v1479_v49, 0.0  ;;  %v387_v11 = vld [vmem:[%s2588_s29 + $0x140] sm:$0xff] }
 0x2d7   : > { %v431_v55 = vpack.c.bf16 %v388_v21, %v387_v11 }
 0x2d8   : > { %2178 = vst.msk [vmem:[%s2706_s16 + $0xa0] sm:$0xff] %vm2157_vm2, %v2113_v2  ;;  %v1611_v62 = vmul.f32 %v2971_v13, %v1543_v54  ;;  %v3009_v17 = vpop.f32.mrf.mxu3 }
 0x2d9   : > { %v1948_v47 = vpop.permute.xlu0 %1947  ;;  %2457 = vmatmul.msk.bf16.gmra.mxu3 %vm781_vm0, %v431_v55  ;;  %2425 = vmatmul.msk.bf16.gmra.mxu2 %vm781_vm0, %v431_v55  ;;  %v1136_v9 = vpop.f32.mrf.mxu2 }
 0x2da   : > { %2335 = vmatmul.msk.bf16.gmra.mxu0 %vm475_vm1, %v333_v33  ;;  %2393 = vmatmul.msk.bf16.gmra.mxu1 %vm781_vm0, %v431_v55 }
 0x2db   : > { %1695 = vadd.xlane.f32.xlu1 %v1606_v25  ;;  %v1950_v58 = vpop.permute.xlu2 %1949 }
 0x2dc   : > { %v967_v50 = vpop.f32.mrf.mxu1 }
 0x2e0   : > { %v1946_v51 = vpop.permute.xlu1 %1945  ;;  %v3021_v2 = vpop.f32.mrf.mxu3 }
 0x2e1   : > { %v1138_v32 = vpop.f32.mrf.mxu2 }
 0x2e2   : > { %1697 = vadd.xlane.f32.xlu2 %v1607_v28 }
 0x2e3   : > { %1959 = vrot.lane.b32.xlu0 %v2977_v23, %s2501_s11 }
 0x2e4   : > { %v969_v26 = vpop.f32.mrf.mxu1 }
 0x2e9   : > { %2458 = vmatmul.msk.bf16.gmra.mxu3 %vm781_vm0, %v432_v48  ;;  %2426 = vmatmul.msk.bf16.gmra.mxu2 %vm781_vm0, %v432_v48 }
 0x2ea   : > { %2394 = vmatmul.msk.bf16.gmra.mxu1 %vm781_vm0, %v432_v48 }
 0x2ec   : > { %v972_v4 = vpop.f32.mrf.mxu1 }
 0x2f4   : > { %1957 = vrot.lane.b32.xlu1 %v2961_v24, %s2501_s11 }
 0x2fa   : > { %1961 = vrot.lane.b32.xlu2 %v2984_v41, %s2501_s11 }
 0x304   : > { %v1694_v52 = vpop.xlane.xlu0 %1693 }
 0x305   : > { %v1797_v56 = vmul.f32 %v1694_v52, %v2907_v7  ;;  %v3040_v52 = vpop.f32.mrf.mxu3 }
 0x307   : > { %v2117_v40 = vadd.f32 %v1950_v58, %v1797_v56 }
 0x309   : > { %2182 = vst.msk [vmem:[%s2706_s16 + $0xc0] sm:$0xff] %vm2157_vm2, %v2117_v40  ;;  %v661_v22 = vpop.f32.mrf.mxu0 }
 0x30a   : > { %v1417_v56 = vmul.f32 %v967_v50, %v661_v22 }
 0x30b   : > { %v1690_v63 = vpop.xlane.xlu1 %1689 }
 0x30c   : > { %v1795_v0 = vmul.f32 %v1690_v63, %v2895_v59  ;;  %v334_v59 = vpack.c.bf16 %v290_v14, %v289_v12  ;;  %v974_v12 = vpop.f32.mrf.mxu1 }
 0x30d   : > { %1705 = vadd.xlane.f32.xlu0 %v1611_v62  ;;  %v1481_v62 = vadd.f32 %v1417_v56, %v1136_v9  ;;  %v3047_v6 = vpop.f32.mrf.mxu3  ;;  %v393_v56 = vld [vmem:[%s2588_s29 + $0x170] sm:$0xff] }
 0x30e   : > { %v2115_v3 = vadd.f32 %v1946_v51, %v1795_v0  ;;  %2336 = vmatmul.msk.bf16.gmra.mxu0 %vm475_vm1, %v334_v59  ;;  %v1416_v51 = vmul.f32 %v964_v5, %v658_v19 }
 0x30f   : > { %v1545_v1 = vmax.f32 %v1481_v62, 0.0 }
 0x310   : > { %2180 = vst.msk [vmem:[%s2706_s16 + $0xb0] sm:$0xff] %vm2157_vm2, %v2115_v3  ;;  %v1480_v40 = vadd.f32 %v1416_v51, %v1133_v20  ;;  %v293_v3 = vld [vmem:[%s2599_s8 + $0x150] sm:$0xff] }
 0x311   : > { %v663_v28 = vpop.f32.mrf.mxu0 }
 0x312   : > { %v1418_v30 = vmul.f32 %v969_v26, %v663_v28  ;;  %v1544_v0 = vmax.f32 %v1480_v40, 0.0 }
 0x314   : > { %v1692_v7 = vpop.xlane.xlu2 %1691  ;;  %v1482_v33 = vadd.f32 %v1418_v30, %v1138_v32  ;;  %v1612_v8 = vmul.f32 %v2971_v13, %v1544_v0  ;;  %v295_v32 = vld [vmem:[%s2599_s8 + $0x160] sm:$0xff] }
 0x315   : > { %v1796_v61 = vmul.f32 %v1692_v7, %v2898_v60  ;;  %v1610_v60 = vmul.f32 %v2971_v13, %v1542_v18 }
 0x316   : > { %v1546_v37 = vmax.f32 %v1482_v33, 0.0  ;;  %v296_v33 = vld [vmem:[%s2599_s8 + $0x168] sm:$0xff] }
 0x317   : > { %v2116_v57 = vadd.f32 %v1948_v47, %v1796_v61  ;;  %v1954_v25 = vpop.permute.xlu0 %1953 }
 0x318   : > { %v1614_v47 = vmul.f32 %v2971_v13, %v1546_v37 }
 0x319   : > { %2181 = vst.msk [vmem:[%s2706_s16 + $0xb8] sm:$0xff] %vm2157_vm2, %v2116_v57  ;;  %v1141_v57 = vpop.f32.mrf.mxu2 }
 0x31c   : > { %v1956_v38 = vpop.permute.xlu2 %1955 }
 0x31e   : > { %1701 = vadd.xlane.f32.xlu1 %v1609_v16  ;;  %2337 = vmatmul.msk.bf16.gmra.mxu0 %vm475_vm1, %v335_v34  ;;  %v392_v16 = vld [vmem:[%s2588_s29 + $0x168] sm:$0xff] }
 0x31f   : > { %v433_v18 = vpack.c.bf16 %v392_v16, %v391_v15  ;;  %v297_v15 = vld [vmem:[%s2599_s8 + $0x170] sm:$0xff]  ;;  %v298_v16 = vld [vmem:[%s2599_s8 + $0x178] sm:$0xff] }
 0x321   : > { %1965 = vrot.lane.b32.xlu0 %v3009_v17, %s2501_s11  ;;  %v1143_v59 = vpop.f32.mrf.mxu2  ;;  %2459 = vmatmul.msk.bf16.gmra.mxu3 %vm781_vm0, %v433_v18 }
 0x322   : > { %2427 = vmatmul.msk.bf16.gmra.mxu2 %vm781_vm0, %v433_v18  ;;  %2395 = vmatmul.msk.bf16.gmra.mxu1 %vm781_vm0, %v433_v18  ;;  %v338_v18 = vpack.c.bf16 %v298_v16, %v297_v15 }
 0x323   : > { %1703 = vadd.xlane.f32.xlu2 %v1610_v60  ;;  %v1952_v39 = vpop.permute.xlu1 %1951  ;;  %v977_v60 = vpop.f32.mrf.mxu1 }
 0x325   : > { %v3059_v20 = vpop.f32.mrf.mxu3 }
 0x329   : > { %v1146_v21 = vpop.f32.mrf.mxu2 }
 0x32d   : > { %v3072_v37 = vpop.f32.mrf.mxu3 }
 0x331   : > { %v1148_v51 = vpop.f32.mrf.mxu2 }
 0x337   : > { %1963 = vrot.lane.b32.xlu1 %v3001_v10, %s2501_s11 }
 0x33b   : > { %1967 = vrot.lane.b32.xlu2 %v3021_v2, %s2501_s11 }
 0x342   : > { %v1700_v35 = vpop.xlane.xlu0 %1699 }
 0x343   : > { %v1800_v36 = vmul.f32 %v1700_v35, %v2943_v53  ;;  %v337_v35 = vpack.c.bf16 %v296_v33, %v295_v32 }
 0x345   : > { %v2120_v31 = vadd.f32 %v1956_v38, %v1800_v36 }
 0x347   : > { %2185 = vst.msk [vmem:[%s2706_s16 + $0xd8] sm:$0xff] %vm2157_vm2, %v2120_v31  ;;  %v666_v61 = vpop.f32.mrf.mxu0 }
 0x348   : > { %v1419_v38 = vmul.f32 %v972_v4, %v666_v61 }
 0x34a   : > { %v1483_v29 = vadd.f32 %v1419_v38, %v1141_v57 }
 0x34b   : > { %1711 = vadd.xlane.f32.xlu0 %v1614_v47  ;;  %v3080_v47 = vpop.f32.mrf.mxu3 }
 0x34c   : > { %v1547_v48 = vmax.f32 %v1483_v29, 0.0  ;;  %v397_v29 = vld [vmem:[%s2588_s29 + $0x190] sm:$0xff] }
 0x34e   : > { %v1696_v53 = vpop.xlane.xlu1 %1695 }
 0x34f   : > { %v1798_v43 = vmul.f32 %v1696_v53, %v2929_v45  ;;  %v294_v45 = vld [vmem:[%s2599_s8 + $0x158] sm:$0xff]  ;;  %v668_v14 = vpop.f32.mrf.mxu0 }
 0x350   : > { %v336_v7 = vpack.c.bf16 %v294_v45, %v293_v3  ;;  %v1420_v31 = vmul.f32 %v974_v12, %v668_v14 }
 0x351   : > { %v2118_v49 = vadd.f32 %v1952_v39, %v1798_v43 }
 0x352   : > { %2338 = vmatmul.msk.bf16.gmra.mxu0 %vm475_vm1, %v336_v7  ;;  %v1484_v34 = vadd.f32 %v1420_v31, %v1143_v59 }
 0x353   : > { %2183 = vst.msk [vmem:[%s2706_s16 + $0xc8] sm:$0xff] %vm2157_vm2, %v2118_v49 }
 0x354   : > { %v1548_v53 = vmax.f32 %v1484_v34, 0.0  ;;  %v398_v34 = vld [vmem:[%s2588_s29 + $0x198] sm:$0xff] }
 0x355   : > { %v1698_v54 = vpop.xlane.xlu2 %1697  ;;  %v1960_v5 = vpop.permute.xlu0 %1959 }
 0x356   : > { %v1799_v58 = vmul.f32 %v1698_v54, %v2933_v27  ;;  %v1613_v27 = vmul.f32 %v2971_v13, %v1545_v1  ;;  %v1616_v43 = vmul.f32 %v2971_v13, %v1548_v53  ;;  %v394_v54 = vld [vmem:[%s2588_s29 + $0x178] sm:$0xff] }
 0x357   : > { %v671_v19 = vpop.f32.mrf.mxu0 }
 0x358   : > { %v2119_v63 = vadd.f32 %v1954_v25, %v1799_v58  ;;  %v1421_v11 = vmul.f32 %v977_v60, %v671_v19  ;;  %v434_v58 = vpack.c.bf16 %v394_v54, %v393_v56  ;;  %v395_v19 = vld [vmem:[%s2588_s29 + $0x180] sm:$0xff] }
 0x35a   : > { %2184 = vst.msk [vmem:[%s2706_s16 + $0xd0] sm:$0xff] %vm2157_vm2, %v2119_v63  ;;  %v1485_v50 = vadd.f32 %v1421_v11, %v1146_v21  ;;  %2460 = vmatmul.msk.bf16.gmra.mxu3 %vm781_vm0, %v434_v58  ;;  %2428 = vmatmul.msk.bf16.gmra.mxu2 %vm781_vm0, %v434_v58  ;;  %v1151_v63 = vpop.f32.mrf.mxu2 }
 0x35b   : > { %2396 = vmatmul.msk.bf16.gmra.mxu1 %vm781_vm0, %v434_v58 }
 0x35c   : > { %v1549_v9 = vmax.f32 %v1485_v50, 0.0 }
 0x35d   : > { %v1962_v25 = vpop.permute.xlu2 %1961 }
 0x35e   : > { %v1617_v28 = vmul.f32 %v2971_v13, %v1549_v9  ;;  %v300_v9 = vld [vmem:[%s2599_s8 + $0x188] sm:$0xff] }
 0x35f   : > { %1971 = vrot.lane.b32.xlu0 %v3047_v6, %s2501_s11  ;;  %v673_v49 = vpop.f32.mrf.mxu0 }
 0x361   : > { %1707 = vadd.xlane.f32.xlu1 %v1612_v8  ;;  %v3091_v8 = vpop.f32.mrf.mxu3 }
 0x362   : > { %2339 = vmatmul.msk.bf16.gmra.mxu0 %vm475_vm1, %v337_v35  ;;  %v1153_v7 = vpop.f32.mrf.mxu2 }
 0x364   : > { %1709 = vadd.xlane.f32.xlu2 %v1613_v27 }
 0x366   : > { %v1958_v30 = vpop.permute.xlu1 %1957 }
 0x369   : > { %v3106_v11 = vpop.f32.mrf.mxu3 }
 0x371   : > { %v3117_v32 = vpop.f32.mrf.mxu3 }
 0x372   : > { %2340 = vmatmul.msk.bf16.gmra.mxu0 %vm475_vm1, %v338_v18 }
 0x379   : > { %v3131_v58 = vpop.f32.mrf.mxu3 }
 0x37a   : > { %1969 = vrot.lane.b32.xlu1 %v3040_v52, %s2501_s11 }
 0x37c   : > { %1973 = vrot.lane.b32.xlu2 %v3059_v20, %s2501_s11 }
 0x380   : > { %v1706_v22 = vpop.xlane.xlu0 %1705 }
 0x381   : > { %v1803_v55 = vmul.f32 %v1706_v22, %v2984_v41 }
 0x383   : > { %v2123_v26 = vadd.f32 %v1962_v25, %v1803_v55  ;;  %v299_v55 = vld [vmem:[%s2599_s8 + $0x180] sm:$0xff] }
 0x384   : > { %v339_v33 = vpack.c.bf16 %v300_v9, %v299_v55  ;;  %v399_v55 = vld [vmem:[%s2588_s29 + $0x1a0] sm:$0xff]  ;;  %v400_v9 = vld [vmem:[%s2588_s29 + $0x1a8] sm:$0xff] }
 0x385   : > { %2188 = vst.msk [vmem:[%s2706_s16 + $0xf0] sm:$0xff] %vm2157_vm2, %v2123_v26 }
 0x386   : > { %2341 = vmatmul.msk.bf16.gmra.mxu0 %vm475_vm1, %v339_v33 }
 0x389   : > { %1717 = vadd.xlane.f32.xlu0 %v1617_v28 }
 0x38b   : > { %v676_v62 = vpop.f32.mrf.mxu0 }
 0x391   : > { %v1702_v36 = vpop.xlane.xlu1 %1701 }
 0x392   : > { %v1801_v41 = vmul.f32 %v1702_v36, %v2961_v24  ;;  %v1615_v24 = vmul.f32 %v2971_v13, %v1547_v48 }
 0x393   : > { %v1966_v0 = vpop.permute.xlu0 %1965  ;;  %v678_v3 = vpop.f32.mrf.mxu0 }
 0x394   : > { %v2121_v39 = vadd.f32 %v1958_v30, %v1801_v41 }
 0x396   : > { %2186 = vst.msk [vmem:[%s2706_s16 + $0xe0] sm:$0xff] %vm2157_vm2, %v2121_v39  ;;  %v1704_v42 = vpop.xlane.xlu2 %1703 }
 0x397   : > { %v1802_v44 = vmul.f32 %v1704_v42, %v2977_v23  ;;  %v979_v23 = vpop.f32.mrf.mxu1  ;;  %v1156_v42 = vpop.f32.mrf.mxu2 }
 0x398   : > { %v1422_v30 = vmul.f32 %v979_v23, %v673_v49 }
 0x399   : > { %v2122_v46 = vadd.f32 %v1960_v5, %v1802_v44  ;;  %v396_v5 = vld [vmem:[%s2588_s29 + $0x188] sm:$0xff] }
 0x39b   : > { %2187 = vst.msk [vmem:[%s2706_s16 + $0xe8] sm:$0xff] %vm2157_vm2, %v2122_v46  ;;  %v436_v46 = vpack.c.bf16 %v398_v34, %v397_v29 }
 0x39d   : > { %1977 = vrot.lane.b32.xlu0 %v3080_v47, %s2501_s11 }
 0x39e   : > { %v1968_v12 = vpop.permute.xlu2 %1967 }
 0x39f   : > { %v982_v40 = vpop.f32.mrf.mxu1 }
 0x3a0   : > { %v1423_v22 = vmul.f32 %v982_v40, %v676_v62 }
 0x3a2   : > { %v1487_v35 = vadd.f32 %v1423_v22, %v1151_v63 }
 0x3a4   : > { %1713 = vadd.xlane.f32.xlu1 %v1615_v24  ;;  %v1551_v41 = vmax.f32 %v1487_v35, 0.0  ;;  %v1158_v24 = vpop.f32.mrf.mxu2 }
 0x3a5   : > { %1715 = vadd.xlane.f32.xlu2 %v1616_v43 }
 0x3a6   : > { %v1619_v31 = vmul.f32 %v2971_v13, %v1551_v41 }
 0x3a7   : > { %v984_v1 = vpop.f32.mrf.mxu1 }
 0x3a8   : > { %v1424_v45 = vmul.f32 %v984_v1, %v678_v3 }
 0x3a9   : > { %v1964_v60 = vpop.permute.xlu1 %1963 }
 0x3aa   : > { %v1488_v27 = vadd.f32 %v1424_v45, %v1153_v7  ;;  %v3141_v45 = vpop.f32.mrf.mxu3 }
 0x3ac   : > { %v1552_v57 = vmax.f32 %v1488_v27, 0.0  ;;  %v1161_v56 = vpop.f32.mrf.mxu2  ;;  %v301_v27 = vld [vmem:[%s2599_s8 + $0x190] sm:$0xff] }
 0x3ae   : > { %v1620_v59 = vmul.f32 %v2971_v13, %v1552_v57 }
 0x3af   : > { %v987_v38 = vpop.f32.mrf.mxu1 }
 0x3b7   : > { %v989_v53 = vpop.f32.mrf.mxu1 }
 0x3bd   : > { %1975 = vrot.lane.b32.xlu1 %v3072_v37, %s2501_s11  ;;  %1979 = vrot.lane.b32.xlu2 %v3091_v8, %s2501_s11 }
 0x3be   : > { %v1712_v61 = vpop.xlane.xlu0 %1711 }
 0x3bf   : > { %v1806_v4 = vmul.f32 %v1712_v61, %v3021_v2  ;;  %v435_v2 = vpack.c.bf16 %v396_v5, %v395_v19  ;;  %v992_v43 = vpop.f32.mrf.mxu1 }
 0x3c1   : > { %v2126_v14 = vadd.f32 %v1968_v12, %v1806_v4  ;;  %2429 = vmatmul.msk.bf16.gmra.mxu2 %vm781_vm0, %v435_v2  ;;  %2461 = vmatmul.msk.bf16.gmra.mxu3 %vm781_vm0, %v435_v2  ;;  %v3146_v12 = vpop.f32.mrf.mxu3 }
 0x3c2   : > { %2397 = vmatmul.msk.bf16.gmra.mxu1 %vm781_vm0, %v435_v2 }
 0x3c3   : > { %2191 = vst.msk [vmem:[%s2706_s16 + $0x108] sm:$0xff] %vm2157_vm2, %v2126_v14 }
 0x3c7   : > { %1723 = vadd.xlane.f32.xlu0 %v1620_v59  ;;  %v3158_v2 = vpop.f32.mrf.mxu1 }
 0x3d1   : > { %2462 = vmatmul.msk.bf16.gmra.mxu3 %vm781_vm0, %v436_v46  ;;  %2430 = vmatmul.msk.bf16.gmra.mxu2 %vm781_vm0, %v436_v46  ;;  %v1972_v23 = vpop.permute.xlu0 %1971 }
 0x3d2   : > { %2398 = vmatmul.msk.bf16.gmra.mxu1 %vm781_vm0, %v436_v46 }
 0x3d4   : > { %v1708_v21 = vpop.xlane.xlu1 %1707 }
 0x3d5   : > { %v1804_v50 = vmul.f32 %v1708_v21, %v3001_v10  ;;  %v1486_v10 = vadd.f32 %v1422_v30, %v1148_v51 }
 0x3d7   : > { %v2124_v25 = vadd.f32 %v1964_v60, %v1804_v50  ;;  %v1710_v26 = vpop.xlane.xlu2 %1709  ;;  %v1550_v39 = vmax.f32 %v1486_v10, 0.0  ;;  %v3160_v50 = vpop.f32.mrf.mxu2 }
 0x3d8   : > { %v1805_v28 = vmul.f32 %v1710_v26, %v3009_v17  ;;  %v681_v17 = vpop.f32.mrf.mxu0 }
 0x3d9   : > { %2189 = vst.msk [vmem:[%s2706_s16 + $0xf8] sm:$0xff] %vm2157_vm2, %v2124_v25  ;;  %v1618_v44 = vmul.f32 %v2971_v13, %v1550_v39  ;;  %v1425_v16 = vmul.f32 %v987_v38, %v681_v17  ;;  %v437_v25 = vpack.c.bf16 %v400_v9, %v399_v55 }
 0x3da   : > { %v2125_v36 = vadd.f32 %v1966_v0, %v1805_v28  ;;  %v997_v28 = vpop.f32.mrf.mxu1 }
 0x3db   : > { %1983 = vrot.lane.b32.xlu0 %v3117_v32, %s2501_s11 }
 0x3dc   : > { %2190 = vst.msk [vmem:[%s2706_s16 + $0x100] sm:$0xff] %vm2157_vm2, %v2125_v36 }
 0x3df   : > { %v1974_v0 = vpop.permute.xlu2 %1973  ;;  %v1166_v33 = vpop.f32.mrf.mxu2 }
 0x3e0   : > { %v683_v48 = vpop.f32.mrf.mxu0 }
 0x3e1   : > { %v1426_v4 = vmul.f32 %v989_v53, %v683_v48  ;;  %2463 = vmatmul.msk.bf16.gmra.mxu3 %vm781_vm0, %v437_v25  ;;  %2431 = vmatmul.msk.bf16.gmra.mxu2 %vm781_vm0, %v437_v25  ;;  %v304_v48 = vld [vmem:[%s2599_s8 + $0x1a8] sm:$0xff] }
 0x3e2   : > { %2399 = vmatmul.msk.bf16.gmra.mxu1 %vm781_vm0, %v437_v25  ;;  %v999_v36 = vpop.f32.mrf.mxu1 }
 0x3e3   : > { %v1490_v60 = vadd.f32 %v1426_v4, %v1158_v24 }
 0x3e5   : > { %v1554_v21 = vmax.f32 %v1490_v60, 0.0  ;;  %v403_v60 = vld [vmem:[%s2588_s29 + $0x1c0] sm:$0xff] }
 0x3e6   : > { %1721 = vadd.xlane.f32.xlu2 %v1619_v31 }
 0x3e7   : > { %1719 = vadd.xlane.f32.xlu1 %v1618_v44  ;;  %v1622_v22 = vmul.f32 %v2971_v13, %v1554_v21  ;;  %v1168_v17 = vpop.f32.mrf.mxu2  ;;  %v3170_v44 = vpop.f32.mrf.mxu3 }
 0x3e8   : > { %v686_v49 = vpop.f32.mrf.mxu0 }
 0x3e9   : > { %v1427_v51 = vmul.f32 %v992_v43, %v686_v49  ;;  %v401_v49 = vld [vmem:[%s2588_s29 + $0x1b0] sm:$0xff] }
 0x3eb   : > { %v1491_v54 = vadd.f32 %v1427_v51, %v1161_v56  ;;  %v305_v51 = vld [vmem:[%s2599_s8 + $0x1b0] sm:$0xff] }
 0x3ec   : > { %v1970_v7 = vpop.permute.xlu1 %1969 }
 0x3ed   : > { %v1555_v63 = vmax.f32 %v1491_v54, 0.0  ;;  %v306_v54 = vld [vmem:[%s2599_s8 + $0x1b8] sm:$0xff] }
 0x3ef   : > { %v1623_v3 = vmul.f32 %v2971_v13, %v1555_v63  ;;  %v3182_v24 = vpop.f32.mrf.mxu3 }
 0x3f0   : > { %v3156_v5 = vpop.f32.mrf.mxu0 }
 0x3f8   : > { %v691_v30 = vpop.f32.mrf.mxu0 }
 0x3f9   : > { %v1429_v63 = vmul.f32 %v997_v28, %v691_v30 }
 0x3fc   : > { %v1718_v40 = vpop.xlane.xlu0 %1717 }
 0x3fd   : > { %v1809_v62 = vmul.f32 %v1718_v40, %v3059_v20  ;;  %v302_v20 = vld [vmem:[%s2599_s8 + $0x198] sm:$0xff]  ;;  %v3188_v40 = vpop.f32.mrf.mxu3 }
 0x3fe   : > { %1985 = vrot.lane.b32.xlu2 %v3131_v58, %s2501_s11  ;;  %v340_v61 = vpack.c.bf16 %v302_v20, %v301_v27  ;;  %v1002_v20 = vpop.f32.mrf.mxu1 }
 0x3ff   : > { %v2129_v1 = vadd.f32 %v1974_v0, %v1809_v62  ;;  %v342_v62 = vpack.c.bf16 %v306_v54, %v305_v51 }
 0x400   : > { %1981 = vrot.lane.b32.xlu1 %v3106_v11, %s2501_s11  ;;  %2342 = vmatmul.msk.bf16.gmra.mxu0 %vm475_vm1, %v340_v61  ;;  %v693_v10 = vpop.f32.mrf.mxu0  ;;  %v1493_v61 = vadd.f32 %v1429_v63, %v1166_v33 }
 0x401   : > { %2194 = vst.msk [vmem:[%s2706_s16 + $0x120] sm:$0xff] %vm2157_vm2, %v2129_v1  ;;  %v1430_v41 = vmul.f32 %v999_v36, %v693_v10 }
 0x403   : > { %v1494_v38 = vadd.f32 %v1430_v41, %v1168_v17 }
 0x405   : > { %1729 = vadd.xlane.f32.xlu0 %v1623_v3 }
 0x408   : > { %v3198_v27 = vpop.f32.mrf.mxu0 }
 0x409   : > { %v1431_v54 = vmul.f32 %v1002_v20, %v3198_v27 }
 0x40f   : > { %v1978_v35 = vpop.permute.xlu0 %1977 }
 0x417   : > { %v1714_v57 = vpop.xlane.xlu1 %1713 }
 0x418   : > { %v1807_v14 = vmul.f32 %v1714_v57, %v3040_v52  ;;  %v1716_v59 = vpop.xlane.xlu2 %1715  ;;  %v1489_v52 = vadd.f32 %v1425_v16, %v1156_v42  ;;  %v1558_v42 = vmax.f32 %v1494_v38, 0.0  ;;  %v1004_v16 = vpop.f32.mrf.mxu1 }
 0x419   : > { %v1808_v15 = vmul.f32 %v1716_v59, %v3047_v6  ;;  %1989 = vrot.lane.b32.xlu0 %v3146_v12, %s2501_s11  ;;  %v3206_v59 = vpop.f32.mrf.mxu2 }
 0x41a   : > { %v2127_v18 = vadd.f32 %v1970_v7, %v1807_v14  ;;  %v1553_v6 = vmax.f32 %v1489_v52, 0.0  ;;  %v1626_v46 = vmul.f32 %v2971_v13, %v1558_v42  ;;  %v1428_v14 = vmul.f32 %v3158_v2, %v3156_v5  ;;  %v308_v42 = vld [vmem:[%s2599_s8 + $0x1c8] sm:$0xff] }
 0x41b   : > { %v2128_v19 = vadd.f32 %v1972_v23, %v1808_v15  ;;  %v402_v23 = vld [vmem:[%s2588_s29 + $0x1b8] sm:$0xff] }
 0x41c   : > { %2192 = vst.msk [vmem:[%s2706_s16 + $0x110] sm:$0xff] %vm2157_vm2, %v2127_v18  ;;  %v1621_v26 = vmul.f32 %v2971_v13, %v1553_v6  ;;  %v438_v56 = vpack.c.bf16 %v402_v23, %v401_v49  ;;  %v1492_v15 = vadd.f32 %v1428_v14, %v3160_v50  ;;  %v698_v18 = vpop.f32.mrf.mxu0 }
 0x41d   : > { %2193 = vst.msk [vmem:[%s2706_s16 + $0x118] sm:$0xff] %vm2157_vm2, %v2128_v19  ;;  %v404_v19 = vld [vmem:[%s2588_s29 + $0x1c8] sm:$0xff] }
 0x41e   : > { %2432 = vmatmul.msk.bf16.gmra.mxu2 %vm781_vm0, %v438_v56  ;;  %2400 = vmatmul.msk.bf16.gmra.mxu1 %vm781_vm0, %v438_v56  ;;  %v1556_v52 = vmax.f32 %v1492_v15, 0.0  ;;  %v439_v21 = vpack.c.bf16 %v404_v19, %v403_v60 }
 0x41f   : > { %2464 = vmatmul.msk.bf16.gmra.mxu3 %vm781_vm0, %v438_v56 }
 0x420   : > { %v1980_v29 = vpop.permute.xlu2 %1979  ;;  %v1624_v5 = vmul.f32 %v2971_v13, %v1556_v52 }
 0x421   : > { %v1173_v6 = vpop.f32.mrf.mxu2 }
 0x427   : > { %1727 = vadd.xlane.f32.xlu2 %v1622_v22  ;;  %v701_v22 = vpop.f32.mrf.mxu0 }
 0x42a   : > { %1725 = vadd.xlane.f32.xlu1 %v1621_v26 }
 0x42e   : > { %2433 = vmatmul.msk.bf16.gmra.mxu2 %vm781_vm0, %v439_v21  ;;  %2401 = vmatmul.msk.bf16.gmra.mxu1 %vm781_vm0, %v439_v21 }
 0x42f   : > { %v1976_v43 = vpop.permute.xlu1 %1975  ;;  %2465 = vmatmul.msk.bf16.gmra.mxu3 %vm781_vm0, %v439_v21  ;;  %v703_v41 = vpop.f32.mrf.mxu0 }
 0x43a   : > { %v1724_v39 = vpop.xlane.xlu0 %1723 }
 0x43b   : > { %v1812_v31 = vmul.f32 %v1724_v39, %v3091_v8  ;;  %v303_v8 = vld [vmem:[%s2599_s8 + $0x1a0] sm:$0xff] }
 0x43c   : > { %v341_v53 = vpack.c.bf16 %v304_v48, %v303_v8  ;;  %v1432_v48 = vmul.f32 %v1004_v16, %v698_v18 }
 0x43d   : > { %v2132_v34 = vadd.f32 %v1980_v29, %v1812_v31  ;;  %v307_v31 = vld [vmem:[%s2599_s8 + $0x1c0] sm:$0xff] }
 0x43e   : > { %2343 = vmatmul.msk.bf16.gmra.mxu0 %vm475_vm1, %v341_v53  ;;  %v1496_v49 = vadd.f32 %v1432_v48, %v1173_v6 }
 0x43f   : > { %1991 = vrot.lane.b32.xlu2 %v3170_v44, %s2501_s11  ;;  %2197 = vst.msk [vmem:[%s2706_s16 + $0x138] sm:$0xff] %vm2157_vm2, %v2132_v34  ;;  %v1007_v50 = vpop.f32.mrf.mxu1  ;;  %v343_v34 = vpack.c.bf16 %v308_v42, %v307_v31  ;;  %v313_v42 = vld [vmem:[%s2599_s8 + $0x1f0] sm:$0xff] }
 0x440   : > { %v1433_v55 = vmul.f32 %v1007_v50, %v701_v22  ;;  %v1560_v63 = vmax.f32 %v1496_v49, 0.0  ;;  %v407_v22 = vld [vmem:[%s2588_s29 + $0x1e0] sm:$0xff] }
 0x443   : > { %1987 = vrot.lane.b32.xlu1 %v3141_v45, %s2501_s11  ;;  %1735 = vadd.xlane.f32.xlu0 %v1626_v46 }
 0x444   : > { %v1176_v9 = vpop.f32.mrf.mxu2  ;;  %v3217_v36 = vpop.f32.mrf.mxu3 }
 0x445   : > { %v1497_v25 = vadd.f32 %v1433_v55, %v1176_v9  ;;  %v408_v55 = vld [vmem:[%s2588_s29 + $0x1e8] sm:$0xff] }
 0x446   : > { %v441_v9 = vpack.c.bf16 %v408_v55, %v407_v22 }
 0x447   : > { %v1561_v30 = vmax.f32 %v1497_v25, 0.0  ;;  %v1009_v17 = vpop.f32.mrf.mxu1  ;;  %v312_v25 = vld [vmem:[%s2599_s8 + $0x1e8] sm:$0xff] }
 0x448   : > { %v1434_v38 = vmul.f32 %v1009_v17, %v703_v41  ;;  %v409_v17 = vld [vmem:[%s2588_s29 + $0x1f0] sm:$0xff] }
 0x449   : > { %v1629_v10 = vmul.f32 %v2971_v13, %v1561_v30 }
 0x44c   : > { %v1178_v39 = vpop.f32.mrf.mxu2 }
 0x44d   : > { %v1984_v2 = vpop.permute.xlu0 %1983  ;;  %v3230_v29 = vadd.f32 %v1434_v38, %v1178_v39  ;;  %v410_v38 = vld [vmem:[%s2588_s29 + $0x1f8] sm:$0xff] }
 0x44e   : > { %2344 = vmatmul.msk.bf16.gmra.mxu0 %vm475_vm1, %v342_v62  ;;  %v442_v39 = vpack.c.bf16 %v410_v38, %v409_v17 }
 0x454   : > { %v1181_v27 = vpop.f32.mrf.mxu2 }
 0x457   : > { %1995 = vrot.lane.b32.xlu0 %v3188_v40, %s2501_s11 }
 0x459   : > { %v1722_v0 = vpop.xlane.xlu2 %1721 }
 0x45a   : > { %v1811_v1 = vmul.f32 %v1722_v0, %v3080_v47  ;;  %v1720_v3 = vpop.xlane.xlu1 %1719  ;;  %v1557_v47 = vmax.f32 %v1493_v61, 0.0  ;;  %v405_v0 = vld [vmem:[%s2588_s29 + $0x1d0] sm:$0xff]  ;;  %v1495_v61 = vadd.f32 %v1431_v54, %v3206_v59 }
 0x45b   : > { %v1810_v7 = vmul.f32 %v1720_v3, %v3072_v37 }
 0x45c   : > { %v2131_v4 = vadd.f32 %v1978_v35, %v1811_v1  ;;  %v1625_v37 = vmul.f32 %v2971_v13, %v1557_v47  ;;  %v406_v1 = vld [vmem:[%s2588_s29 + $0x1d8] sm:$0xff]  ;;  %v1559_v20 = vmax.f32 %v1495_v61, 0.0  ;;  %v1183_v18 = vpop.f32.mrf.mxu2 }
 0x45d   : > { %v2130_v57 = vadd.f32 %v1976_v43, %v1810_v7  ;;  %v440_v3 = vpack.c.bf16 %v406_v1, %v405_v0  ;;  %v1012_v7 = vpop.f32.mrf.mxu1 }
 0x45e   : > { %2196 = vst.msk [vmem:[%s2706_s16 + $0x130] sm:$0xff] %vm2157_vm2, %v2131_v4  ;;  %2345 = vmatmul.msk.bf16.gmra.mxu0 %vm475_vm1, %v343_v34  ;;  %v309_v4 = vld [vmem:[%s2599_s8 + $0x1d0] sm:$0xff]  ;;  %v1627_v15 = vmul.f32 %v2971_v13, %v1559_v20  ;;  %v314_v34 = vld [vmem:[%s2599_s8 + $0x1f8] sm:$0xff] }
 0x45f   : > { %2195 = vst.msk [vmem:[%s2706_s16 + $0x128] sm:$0xff] %vm2157_vm2, %v2130_v57  ;;  %2466 = vmatmul.msk.bf16.gmra.mxu3 %vm781_vm0, %v440_v3  ;;  %2434 = vmatmul.msk.bf16.gmra.mxu2 %vm781_vm0, %v440_v3  ;;  %v310_v57 = vld [vmem:[%s2599_s8 + $0x1d8] sm:$0xff] }
 0x460   : > { %2402 = vmatmul.msk.bf16.gmra.mxu1 %vm781_vm0, %v440_v3  ;;  %v344_v14 = vpack.c.bf16 %v310_v57, %v309_v4 }
 0x461   : > { %v1986_v33 = vpop.permute.xlu2 %1985 }
 0x465   : > { %v1014_v59 = vpop.f32.mrf.mxu1 }
 0x468   : > { %1733 = vadd.xlane.f32.xlu2 %v1625_v37 }
 0x46d   : > { %1731 = vadd.xlane.f32.xlu1 %v1624_v5  ;;  %v1017_v30 = vpop.f32.mrf.mxu1 }
 0x46e   : > { %2346 = vmatmul.msk.bf16.gmra.mxu0 %vm475_vm1, %v344_v14 }
 0x46f   : > { %2435 = vmatmul.msk.bf16.gmra.mxu2 %vm781_vm0, %v441_v9  ;;  %2467 = vmatmul.msk.bf16.gmra.mxu3 %vm781_vm0, %v441_v9 }
 0x470   : > { %2403 = vmatmul.msk.bf16.gmra.mxu1 %vm781_vm0, %v441_v9 }
 0x472   : > { %v1982_v8 = vpop.permute.xlu1 %1981 }
 0x478   : > { %v1730_v26 = vpop.xlane.xlu0 %1729 }
 0x479   : > { %v1815_v28 = vmul.f32 %v1730_v26, %v3131_v58  ;;  %v3226_v58 = vpop.f32.mrf.mxu3 }
 0x47b   : > { %v2135_v35 = vadd.f32 %v1986_v33, %v1815_v28 }
 0x47d   : > { %2200 = vst.msk [vmem:[%s2706_s16 + $0x150] sm:$0xff] %vm2157_vm2, %v2135_v35 }
 0x47f   : > { %2436 = vmatmul.msk.bf16.gmra.mxu2 %vm781_vm0, %v442_v39  ;;  %2468 = vmatmul.msk.bf16.gmra.mxu3 %vm781_vm0, %v442_v39 }
 0x480   : > { %1997 = vrot.lane.b32.xlu2 %v3217_v36, %s2501_s11  ;;  %2404 = vmatmul.msk.bf16.gmra.mxu1 %vm781_vm0, %v442_v39 }
 0x481   : > { %1741 = vadd.xlane.f32.xlu0 %v1629_v10  ;;  %v3233_v46 = vpop.f32.mrf.mxu3  ;;  %v1186_v10 = vpop.f32.mrf.mxu2 }
 0x486   : > { %1993 = vrot.lane.b32.xlu1 %v3182_v24, %s2501_s11 }
 0x489   : > { %v3259_v50 = vpop.f32.mrf.mxu3  ;;  %v1188_v3 = vpop.f32.mrf.mxu2 }
 0x48b   : > { %v1990_v47 = vpop.permute.xlu0 %1989 }
 0x491   : > { %v3271_v33 = vpop.f32.mrf.mxu3 }
 0x495   : > { %2001 = vrot.lane.b32.xlu0 %v3233_v46, %s2501_s11 }
 0x499   : > { %v3279_v31 = vpop.f32.mrf.mxu3 }
 0x49a   : > { %v1728_v53 = vpop.xlane.xlu2 %1727 }
 0x49b   : > { %v1814_v43 = vmul.f32 %v1728_v53, %v3117_v32  ;;  %v706_v32 = vpop.f32.mrf.mxu0 }
 0x49c   : > { %v1435_v53 = vmul.f32 %v1012_v7, %v706_v32 }
 0x49d   : > { %v2134_v23 = vadd.f32 %v1984_v2, %v1814_v43  ;;  %v1726_v51 = vpop.xlane.xlu1 %1725 }
 0x49e   : > { %v1813_v56 = vmul.f32 %v1726_v51, %v3106_v11  ;;  %v1628_v11 = vmul.f32 %v2971_v13, %v1560_v63 }
 0x49f   : > { %2199 = vst.msk [vmem:[%s2706_s16 + $0x148] sm:$0xff] %vm2157_vm2, %v2134_v23  ;;  %v1499_v23 = vadd.f32 %v1435_v53, %v1181_v27 }
 0x4a0   : > { %v2133_v62 = vadd.f32 %v1982_v8, %v1813_v56  ;;  %v346_v8 = vpack.c.bf16 %v314_v34, %v313_v42 }
 0x4a1   : > { %v1563_v0 = vmax.f32 %v1499_v23, 0.0  ;;  %v1191_v20 = vpop.f32.mrf.mxu2 }
 0x4a2   : > { %2198 = vst.msk [vmem:[%s2706_s16 + $0x140] sm:$0xff] %vm2157_vm2, %v2133_v62  ;;  %v1992_v6 = vpop.permute.xlu2 %1991  ;;  %v1019_v62 = vpop.f32.mrf.mxu1 }
 0x4a3   : > { %v708_v37 = vpop.f32.mrf.mxu0  ;;  %v1631_v61 = vmul.f32 %v2971_v13, %v1563_v0 }
 0x4a4   : > { %v1436_v16 = vmul.f32 %v1014_v59, %v708_v37  ;;  %v3307_v37 = vpop.f32.mrf.mxu3 }
 0x4a6   : > { %v1500_v60 = vadd.f32 %v1436_v16, %v1183_v18 }
 0x4a8   : > { %v1564_v21 = vmax.f32 %v1500_v60, 0.0 }
 0x4a9   : > { %1739 = vadd.xlane.f32.xlu2 %v1628_v11  ;;  %v1562_v11 = vmax.f32 %v3230_v29, 0.0 }
 0x4aa   : > { %v1632_v2 = vmul.f32 %v2971_v13, %v1564_v21 }
 0x4ac   : > { %v3311_v16 = vpop.f32.mrf.mxu3 }
 0x4b0   : > { %1737 = vadd.xlane.f32.xlu1 %v1627_v15 }
 0x4b4   : > { %v3317_v21 = vpop.f32.mrf.mxu3 }
 0x4b5   : > { %v1988_v48 = vpop.permute.xlu1 %1987 }
 0x4b6   : > { %v1736_v19 = vpop.xlane.xlu0 %1735 }
 0x4b7   : > { %v1818_v52 = vmul.f32 %v1736_v19, %v3170_v44  ;;  %v311_v44 = vld [vmem:[%s2599_s8 + $0x1e0] sm:$0xff] }
 0x4b8   : > { %v345_v26 = vpack.c.bf16 %v312_v25, %v311_v44 }
 0x4b9   : > { %v2138_v5 = vadd.f32 %v1992_v6, %v1818_v52  ;;  %v1193_v52 = vpop.f32.mrf.mxu2 }
 0x4ba   : > { %2347 = vmatmul.msk.bf16.gmra.mxu0 %vm475_vm1, %v345_v26 }
 0x4bb   : > { %2203 = vst.msk [vmem:[%s2706_s16 + $0x168] sm:$0xff] %vm2157_vm2, %v2138_v5  ;;  %v711_v28 = vpop.f32.mrf.mxu0 }
 0x4bc   : > { %v1437_v35 = vmul.f32 %v1017_v30, %v711_v28 }
 0x4be   : > { %v3275_v41 = vadd.f32 %v1437_v35, %v1186_v10 }
 0x4bf   : > { %1747 = vadd.xlane.f32.xlu0 %v1632_v2 }
 0x4c1   : > { %2003 = vrot.lane.b32.xlu2 %v3259_v50, %s2501_s11  ;;  %v1196_v26 = vpop.f32.mrf.mxu2 }
 0x4c3   : > { %v713_v63 = vpop.f32.mrf.mxu0 }
 0x4c4   : > { %v1438_v6 = vmul.f32 %v1019_v62, %v713_v63 }
 0x4c6   : > { %v1502_v44 = vadd.f32 %v1438_v6, %v1188_v3 }
 0x4c8   : > { %v1566_v28 = vmax.f32 %v1502_v44, 0.0 }
 0x4c9   : > { %1999 = vrot.lane.b32.xlu1 %v3226_v58, %s2501_s11  ;;  %v1996_v7 = vpop.permute.xlu0 %1995 }
 0x4ca   : > { %2348 = vmatmul.msk.bf16.gmra.mxu0 %vm475_vm1, %v346_v8  ;;  %v1565_v8 = vmax.f32 %v3275_v41, 0.0 }
 0x4cb   : > { %v716_v32 = vpop.f32.mrf.mxu0 }
 0x4d3   : > { %2007 = vrot.lane.b32.xlu0 %v3279_v31, %s2501_s11  ;;  %v718_v18 = vpop.f32.mrf.mxu0 }
 0x4db   : > { %v1734_v43 = vpop.xlane.xlu2 %1733  ;;  %v721_v9 = vpop.f32.mrf.mxu0 }
 0x4dc   : > { %v1817_v49 = vmul.f32 %v1734_v43, %v3146_v12  ;;  %v1022_v12 = vpop.f32.mrf.mxu1 }
 0x4dd   : > { %v1439_v27 = vmul.f32 %v1022_v12, %v716_v32 }
 0x4de   : > { %v2137_v51 = vadd.f32 %v1990_v47, %v1817_v49 }
 0x4df   : > { %v1503_v57 = vadd.f32 %v1439_v27, %v1191_v20 }
 0x4e0   : > { %2202 = vst.msk [vmem:[%s2706_s16 + $0x160] sm:$0xff] %vm2157_vm2, %v2137_v51  ;;  %v1732_v56 = vpop.xlane.xlu1 %1731 }
 0x4e1   : > { %v1816_v54 = vmul.f32 %v1732_v56, %v3141_v45  ;;  %v3300_v45 = vld [vmem:[%s3419_s4] ss:$0 sm:$0xff]  ;;  %v1567_v15 = vmax.f32 %v1503_v57, 0.0 }
 0x4e2   : > { %v1630_v4 = vmul.f32 %v3300_v45, %v1562_v11  ;;  %v1634_v17 = vmul.f32 %v3300_v45, %v1566_v28 }
 0x4e3   : > { %v2136_v1 = vadd.f32 %v1988_v48, %v1816_v54  ;;  %v1998_v13 = vpop.permute.xlu2 %1997  ;;  %v1635_v29 = vmul.f32 %v3300_v45, %v1567_v15  ;;  %v723_v39 = vpop.f32.mrf.mxu0 }
 0x4e4   : > { %v1024_v60 = vpop.f32.mrf.mxu1 }
 0x4e5   : > { %2201 = vst.msk [vmem:[%s2706_s16 + $0x158] sm:$0xff] %vm2157_vm2, %v2136_v1  ;;  %v1440_v19 = vmul.f32 %v1024_v60, %v718_v18 }
 0x4ea   : > { %1745 = vadd.xlane.f32.xlu2 %v1631_v61  ;;  %v3336_v61 = vpop.f32.mrf.mxu3 }
 0x4eb   : > { %v726_v53 = vpop.f32.mrf.mxu0 }
 0x4ec   : > { %v1027_v55 = vpop.f32.mrf.mxu1 }
 0x4f3   : > { %1743 = vadd.xlane.f32.xlu1 %v1630_v4  ;;  %v728_v1 = vpop.f32.mrf.mxu0 }
 0x4f4   : > { %v1742_v14 = vpop.xlane.xlu0 %1741  ;;  %v1029_v38 = vpop.f32.mrf.mxu1 }
 0x4f5   : > { %v1821_v47 = vmul.f32 %v1742_v14, %v3217_v36  ;;  %v3313_v36 = vadd.f32 %v1440_v19, %v1193_v52  ;;  %v1442_v34 = vmul.f32 %v1029_v38, %v723_v39 }
 0x4f7   : > { %v2141_v59 = vadd.f32 %v1998_v13, %v1821_v47 }
 0x4f8   : > { %v1994_v5 = vpop.permute.xlu1 %1993 }
 0x4f9   : > { %2206 = vst.msk [vmem:[%s2706_s16 + $0x180] sm:$0xff] %vm2157_vm2, %v2141_v59  ;;  %v1441_v59 = vmul.f32 %v1027_v55, %v721_v9 }
 0x4fb   : > { %v1505_v19 = vadd.f32 %v1441_v59, %v1196_v26 }
 0x4fc   : > { %v1032_v43 = vpop.f32.mrf.mxu1 }
 0x4fd   : > { %1753 = vadd.xlane.f32.xlu0 %v1635_v29  ;;  %v1443_v49 = vmul.f32 %v1032_v43, %v726_v53  ;;  %v1569_v6 = vmax.f32 %v1505_v19, 0.0 }
 0x4ff   : > { %v1637_v28 = vmul.f32 %v3300_v45, %v1569_v6 }
 0x502   : > { %2009 = vrot.lane.b32.xlu2 %v3307_v37, %s2501_s11 }
 0x504   : > { %v1034_v3 = vpop.f32.mrf.mxu1 }
 0x507   : > { %v2002_v42 = vpop.permute.xlu0 %2001 }
 0x50c   : > { %2005 = vrot.lane.b32.xlu1 %v3271_v33, %s2501_s11  ;;  %v1037_v27 = vpop.f32.mrf.mxu1 }
 0x511   : > { %2013 = vrot.lane.b32.xlu0 %v3317_v21, %s2501_s11 }
 0x514   : > { %v1039_v4 = vpop.f32.mrf.mxu1 }
 0x51c   : > { %v1740_v2 = vpop.xlane.xlu2 %1739 }
 0x51d   : > { %v1820_v22 = vmul.f32 %v1740_v2, %v3188_v40  ;;  %v1198_v40 = vpop.f32.mrf.mxu2 }
 0x51e   : > { %v1506_v48 = vadd.f32 %v1442_v34, %v1198_v40 }
 0x51f   : > { %v2140_v25 = vadd.f32 %v1996_v7, %v1820_v22  ;;  %v1444_v7 = vmul.f32 %v1034_v3, %v728_v1 }
 0x520   : > { %v1570_v62 = vmax.f32 %v1506_v48, 0.0 }
 0x521   : > { %2205 = vst.msk [vmem:[%s2706_s16 + $0x178] sm:$0xff] %vm2157_vm2, %v2140_v25 }
 0x522   : > { %v1638_v41 = vmul.f32 %v3300_v45, %v1570_v62 }
 0x523   : > { %v1738_v30 = vpop.xlane.xlu1 %1737 }
 0x524   : > { %v1819_v35 = vmul.f32 %v1738_v30, %v3182_v24  ;;  %v1633_v24 = vmul.f32 %v3300_v45, %v1565_v8  ;;  %v2004_v63 = vpop.permute.xlu2 %2003 }
 0x525   : > { %v1201_v23 = vpop.f32.mrf.mxu2 }
 0x526   : > { %v2139_v10 = vadd.f32 %v1994_v5, %v1819_v35  ;;  %v3330_v56 = vadd.f32 %v1443_v49, %v1201_v23  ;;  %v1042_v5 = vpop.f32.mrf.mxu1 }
 0x528   : > { %2204 = vst.msk [vmem:[%s2706_s16 + $0x170] sm:$0xff] %vm2157_vm2, %v2139_v10 }
 0x52b   : > { %1751 = vadd.xlane.f32.xlu2 %v1634_v17 }
 0x52d   : > { %v1203_v12 = vpop.f32.mrf.mxu2 }
 0x52e   : > { %v3338_v32 = vadd.f32 %v1444_v7, %v1203_v12  ;;  %v1044_v35 = vpop.f32.mrf.mxu1 }
 0x532   : > { %v1748_v51 = vpop.xlane.xlu0 %1747 }
 0x533   : > { %v1824_v54 = vmul.f32 %v1748_v51, %v3259_v50  ;;  %v3342_v50 = vpop.f32.mrf.mxu3 }
 0x535   : > { %v2144_v0 = vadd.f32 %v2004_v63, %v1824_v54  ;;  %v1206_v20 = vpop.f32.mrf.mxu2 }
 0x536   : > { %1749 = vadd.xlane.f32.xlu1 %v1633_v24 }
 0x537   : > { %2209 = vst.msk [vmem:[%s2706_s16 + $0x198] sm:$0xff] %vm2157_vm2, %v2144_v0  ;;  %v731_v11 = vpop.f32.mrf.mxu0 }
 0x538   : > { %v1445_v9 = vmul.f32 %v1037_v27, %v731_v11 }
 0x53b   : > { %1759 = vadd.xlane.f32.xlu0 %v1638_v41  ;;  %v3344_v13 = vpop.f32.mrf.mxu3  ;;  %v2000_v18 = vpop.permute.xlu1 %1999  ;;  %v1572_v41 = vmax.f32 %v3338_v32, 0.0 }
 0x53d   : > { %v1208_v47 = vpop.f32.mrf.mxu2  ;;  %v1640_v12 = vmul.f32 %v3300_v45, %v1572_v41 }
 0x53f   : > { %v733_v57 = vpop.f32.mrf.mxu0 }
 0x540   : > { %v1446_v14 = vmul.f32 %v1039_v4, %v733_v57 }
 0x542   : > { %v3346_v15 = vadd.f32 %v1446_v14, %v1208_v47 }
 0x543   : > { %2015 = vrot.lane.b32.xlu2 %v3336_v61, %s2501_s11  ;;  %v1375_v23 = vpop.f32.mrf.mxu3 }
 0x544   : > { %v1574_v47 = vmax.f32 %v3346_v15, 0.0 }
 0x545   : > { %v2008_v25 = vpop.permute.xlu0 %2007  ;;  %v1211_v55 = vpop.f32.mrf.mxu2 }
 0x546   : > { %v1642_v59 = vmul.f32 %v3300_v45, %v1574_v47 }
 0x547   : > { %v736_v2 = vpop.f32.mrf.mxu0 }
 0x548   : > { %v1447_v63 = vmul.f32 %v1042_v5, %v736_v2 }
 0x54a   : > { %v1511_v1 = vadd.f32 %v1447_v63, %v1211_v55 }
 0x54c   : > { %v1575_v27 = vmax.f32 %v1511_v1, 0.0 }
 0x54d   : > { %v1213_v40 = vpop.f32.mrf.mxu2 }
 0x54e   : > { %v1643_v57 = vmul.f32 %v3300_v45, %v1575_v27 }
 0x54f   : > { %2011 = vrot.lane.b32.xlu1 %v3311_v16, %s2501_s11  ;;  %2019 = vrot.lane.b32.xlu0 %v3344_v13, %s2501_s11  ;;  %v738_v26 = vpop.f32.mrf.mxu0 }
 0x55d   : > { %v1746_v29 = vpop.xlane.xlu2 %1745 }
 0x55e   : > { %v1823_v60 = vmul.f32 %v1746_v29, %v3233_v46  ;;  %v1509_v46 = vadd.f32 %v1445_v9, %v1206_v20 }
 0x560   : > { %v2143_v52 = vadd.f32 %v2002_v42, %v1823_v60  ;;  %v1573_v38 = vmax.f32 %v1509_v46, 0.0  ;;  %v1448_v42 = vmul.f32 %v1044_v35, %v738_v26 }
 0x562   : > { %2208 = vst.msk [vmem:[%s2706_s16 + $0x190] sm:$0xff] %vm2157_vm2, %v2143_v52  ;;  %v1641_v8 = vmul.f32 %v3300_v45, %v1573_v38  ;;  %v1512_v48 = vadd.f32 %v1448_v42, %v1213_v40 }
 0x564   : > { %v1576_v43 = vmax.f32 %v1512_v48, 0.0 }
 0x565   : > { %v2010_v17 = vpop.permute.xlu2 %2009 }
 0x566   : > { %v1744_v22 = vpop.xlane.xlu1 %1743  ;;  %v1644_v49 = vmul.f32 %v3300_v45, %v1576_v43 }
 0x567   : > { %v1822_v44 = vmul.f32 %v1744_v22, %v3226_v58  ;;  %v1568_v58 = vmax.f32 %v3313_v36, 0.0 }
 0x569   : > { %v2142_v30 = vadd.f32 %v2000_v18, %v1822_v44  ;;  %v1636_v53 = vmul.f32 %v3300_v45, %v1568_v58 }
 0x56b   : > { %2207 = vst.msk [vmem:[%s2706_s16 + $0x188] sm:$0xff] %vm2157_vm2, %v2142_v30 }
 0x56c   : > { %1757 = vadd.xlane.f32.xlu2 %v1637_v28 }
 0x570   : > { %v1754_v10 = vpop.xlane.xlu0 %1753 }
 0x571   : > { %v1827_v39 = vmul.f32 %v1754_v10, %v3307_v37  ;;  %v3367_v37 = vpop.f32.mrf.mxu3 }
 0x573   : > { %v2147_v34 = vadd.f32 %v2010_v17, %v1827_v39 }
 0x575   : > { %2212 = vst.msk [vmem:[%s2706_s16 + $0x1b0] sm:$0xff] %vm2157_vm2, %v2147_v34 }
 0x579   : > { %1755 = vadd.xlane.f32.xlu1 %v1636_v53  ;;  %1765 = vadd.xlane.f32.xlu0 %v1641_v8  ;;  %v1380_v36 = vpop.f32.mrf.mxu3 }
 0x57e   : > { %v2006_v54 = vpop.permute.xlu1 %2005 }
 0x581   : > { %1771 = vadd.xlane.f32.xlu0 %v1644_v49  ;;  %v1382_v29 = vpop.f32.mrf.mxu3 }
 0x583   : > { %v2014_v0 = vpop.permute.xlu0 %2013 }
 0x584   : > { %2021 = vrot.lane.b32.xlu2 %v1375_v23, %s2501_s11 }
 0x592   : > { %2017 = vrot.lane.b32.xlu1 %v3342_v50, %s2501_s11 }
 0x595   : > { %2025 = vrot.lane.b32.xlu0 %v1380_v36, %s2501_s11 }
 0x59e   : > { %v1752_v24 = vpop.xlane.xlu2 %1751 }
 0x59f   : > { %v1826_v51 = vmul.f32 %v1752_v24, %v3279_v31 }
 0x5a1   : > { %v2146_v62 = vadd.f32 %v2008_v25, %v1826_v51 }
 0x5a3   : > { %2211 = vst.msk [vmem:[%s2706_s16 + $0x1a8] sm:$0xff] %vm2157_vm2, %v2146_v62 }
 0x5a6   : > { %v2016_v20 = vpop.permute.xlu2 %2015 }
 0x5a9   : > { %v1750_v3 = vpop.xlane.xlu1 %1749 }
 0x5aa   : > { %v1825_v7 = vmul.f32 %v1750_v3, %v3271_v33  ;;  %v1571_v33 = vmax.f32 %v3330_v56, 0.0 }
 0x5ac   : > { %v2145_v11 = vadd.f32 %v2006_v54, %v1825_v7  ;;  %v1639_v32 = vmul.f32 %v3300_v45, %v1571_v33 }
 0x5ad   : > { %1763 = vadd.xlane.f32.xlu2 %v1640_v12 }
 0x5ae   : > { %2210 = vst.msk [vmem:[%s2706_s16 + $0x1a0] sm:$0xff] %vm2157_vm2, %v2145_v11  ;;  %v1760_v31 = vpop.xlane.xlu0 %1759 }
 0x5af   : > { %v1830_v4 = vmul.f32 %v1760_v31, %v3336_v61 }
 0x5b1   : > { %v2150_v14 = vadd.f32 %v2016_v20, %v1830_v4 }
 0x5b3   : > { %2215 = vst.msk [vmem:[%s2706_s16 + $0x1c8] sm:$0xff] %vm2157_vm2, %v2150_v14 }
 0x5b5   : > { %1769 = vadd.xlane.f32.xlu2 %v1643_v57 }
 0x5bc   : > { %1761 = vadd.xlane.f32.xlu1 %v1639_v32 }
 0x5c1   : > { %v2020_v60 = vpop.permute.xlu0 %2019  ;;  %v2012_v19 = vpop.permute.xlu1 %2011 }
 0x5c4   : > { %1767 = vadd.xlane.f32.xlu1 %v1642_v59 }
 0x5cd   : > { %2027 = vrot.lane.b32.xlu2 %v1382_v29, %s2501_s11 }
 0x5dd   : > { %2023 = vrot.lane.b32.xlu1 %v3367_v37, %s2501_s11 }
 0x5df   : > { %v1758_v61 = vpop.xlane.xlu2 %1757 }
 0x5e0   : > { %v1829_v18 = vmul.f32 %v1758_v61, %v3317_v21 }
 0x5e2   : > { %v2149_v56 = vadd.f32 %v2014_v0, %v1829_v18 }
 0x5e4   : > { %2214 = vst.msk [vmem:[%s2706_s16 + $0x1c0] sm:$0xff] %vm2157_vm2, %v2149_v56 }
 0x5e7   : > { %v2022_v6 = vpop.permute.xlu2 %2021 }
 0x5ec   : > { %v1756_v15 = vpop.xlane.xlu1 %1755  ;;  %v1766_v52 = vpop.xlane.xlu0 %1765 }
 0x5ed   : > { %v1828_v45 = vmul.f32 %v1756_v15, %v3311_v16  ;;  %v1833_v5 = vmul.f32 %v1766_v52, %v1375_v23 }
 0x5ef   : > { %v2148_v2 = vadd.f32 %v2012_v19, %v1828_v45  ;;  %v2153_v22 = vadd.f32 %v2022_v6, %v1833_v5 }
 0x5f1   : > { %2213 = vst.msk [vmem:[%s2706_s16 + $0x1b8] sm:$0xff] %vm2157_vm2, %v2148_v2 }
 0x5f2   : > { %2218 = vst.msk [vmem:[%s2706_s16 + $0x1e0] sm:$0xff] %vm2157_vm2, %v2153_v22 }
 0x5f4   : > { %v1772_v21 = vpop.xlane.xlu0 %1771 }
 0x5f5   : > { %v1836_v26 = vmul.f32 %v1772_v21, %v1382_v29 }
 0x604   : > { %v2018_v16 = vpop.permute.xlu1 %2017 }
 0x607   : > { %v2026_v55 = vpop.permute.xlu0 %2025 }
 0x620   : > { %v1764_v44 = vpop.xlane.xlu2 %1763 }
 0x621   : > { %v1832_v25 = vmul.f32 %v1764_v44, %v3344_v13 }
 0x623   : > { %v2152_v28 = vadd.f32 %v2020_v60, %v1832_v25 }
 0x625   : > { %2217 = vst.msk [vmem:[%s2706_s16 + $0x1d8] sm:$0xff] %vm2157_vm2, %v2152_v28 }
 0x628   : > { %v1770_v30 = vpop.xlane.xlu2 %1769 }
 0x629   : > { %v1835_v9 = vmul.f32 %v1770_v30, %v1380_v36 }
 0x62b   : > { %v2155_v46 = vadd.f32 %v2026_v55, %v1835_v9 }
 0x62d   : > { %2220 = vst.msk [vmem:[%s2706_s16 + $0x1f0] sm:$0xff] %vm2157_vm2, %v2155_v46 }
 0x62f   : > { %v1762_v35 = vpop.xlane.xlu1 %1761 }
 0x630   : > { %v1831_v10 = vmul.f32 %v1762_v35, %v3342_v50  ;;  %v2028_v17 = vpop.permute.xlu2 %2027 }
 0x631   : > { %v2156_v38 = vadd.f32 %v2028_v17, %v1836_v26 }
 0x632   : > { %v2151_v39 = vadd.f32 %v2018_v16, %v1831_v10 }
 0x633   : > { %2221 = vst.msk [vmem:[%s2706_s16 + $0x1f8] sm:$0xff] %vm2157_vm2, %v2156_v38 }
 0x634   : > { %2216 = vst.msk [vmem:[%s2706_s16 + $0x1d0] sm:$0xff] %vm2157_vm2, %v2151_v39 }
 0x637   : > { %v1768_v13 = vpop.xlane.xlu1 %1767 }
 0x638   : > { %v1834_v42 = vmul.f32 %v1768_v13, %v3367_v37 }
 0x64f   : > { %v2024_v58 = vpop.permute.xlu1 %2023 }
 0x650   : > { %v2154_v40 = vadd.f32 %v2024_v58, %v1834_v42 }
 0x652   : > { %2219 = vst.msk [vmem:[%s2706_s16 + $0x1e8] sm:$0xff] %vm2157_vm2, %v2154_v40 }
 0x653 PF: > { %s15_s18 = sadd.s32 1, %s2499_s18  }
 0x654   : > { %p12_p4 = scmp.ge.s32.totalorder %s15_s18, 4  }
 0x656   :  { %14 = sbr.rel (!%p12_p4) target bundleno = 1 (0x1), region = 73 }

</bundles_post_ra>
